<compile_context>
chip_gen: v7x
topology: tpu7x:2x2x1
jax: 0.10.0
libtpu: 0.0.40
codegen_flags: <defaults>
</compile_context>

<pallas_src>
import math

import jax
import jax.numpy as jnp
from jax import lax
from jax.experimental import pallas as pl
from jax.experimental.pallas import tpu as pltpu


def _make_kernel(nhead: int, head_dim: int, d_model: int, block_q: int, lk: int):
    scale = 1.0 / math.sqrt(head_dim)
    # Head-batched attention matmuls (head axis = leading batch dim).
    dn_qk = (((2,), (2,)), ((0,), (0,)))   # (h,q,hd) x (h,k,hd) -> (h,q,k)
    dn_pv = (((2,), (1,)), ((0,), (0,)))   # (h,q,k)  x (h,k,hd) -> (h,q,hd)

    def kernel(tgt_ref, mem_ref, qpos_ref, kpos_ref,
               wq_ref, wk_ref, wv_ref, wo_ref,        # (D, D)  packed W^T
               bq_ref, bk_ref, bv_ref, bo_ref,        # (1, D)  f32
               lnw_ref, lnb_ref,                      # (1, D)  f32
               out_ref,
               k_scr, v_scr):                         # (h, Lk, hd) compute dtype
        qi = pl.program_id(1)
        cdt = k_scr.dtype                             # compute / MXU dtype

        # ---- K/V projection hoisted out of the q-tile loop (once per batch) --
        @pl.when(qi == 0)
        def _():
            mem = mem_ref[0]                                       # (Lk, D)
            k_in = (mem + kpos_ref[0]).astype(cdt)
            # Packed lane-dense (Lk, D) x (D, D) GEMMs -> full MXU width.
            k = jnp.dot(k_in, wk_ref[...],
                        preferred_element_type=jnp.float32) + bk_ref[...]
            v = jnp.dot(mem.astype(cdt), wv_ref[...],
                        preferred_element_type=jnp.float32) + bv_ref[...]
            # Single head-split relayout, reused by every q tile.
            k_scr[...] = jnp.transpose(
                k.reshape(lk, nhead, head_dim), (1, 0, 2)).astype(cdt)
            v_scr[...] = jnp.transpose(
                v.reshape(lk, nhead, head_dim), (1, 0, 2)).astype(cdt)

        # ---- Q projection for this tile (packed, lane-dense) -----------------
        tgt = tgt_ref[0]                                           # (blk_q, D)
        q_in = (tgt + qpos_ref[0]).astype(cdt)
        q = jnp.dot(q_in, wq_ref[...], preferred_element_type=jnp.float32)
        q = (q + bq_ref[...]) * scale                              # f32
        qh = jnp.transpose(q.reshape(block_q, nhead, head_dim),
                           (1, 0, 2)).astype(cdt)                  # (h, bq, hd)

        # ---- scaled-dot-product attention (f32 accumulation) -----------------
        s = lax.dot_general(qh, k_scr[...], dn_qk,
                            preferred_element_type=jnp.float32)    # (h, bq, Lk)
        s = s - jnp.max(s, axis=-1, keepdims=True)
        p = jnp.exp(s)
        p = p / jnp.sum(p, axis=-1, keepdims=True)     # exact reciprocal
        o = lax.dot_general(p.astype(cdt), v_scr[...], dn_pv,
                            preferred_element_type=jnp.float32)    # (h, bq, hd)

        # ---- merge heads -> packed layout, single full-D output projection ---
        o_packed = jnp.transpose(o, (1, 0, 2)).reshape(block_q, d_model)
        attn = jnp.dot(o_packed.astype(cdt), wo_ref[...],
                       preferred_element_type=jnp.float32)         # (blk_q, D)

        # ---- fused epilogue: out bias + residual + LayerNorm (f32, eps=1e-5) -
        x = tgt.astype(jnp.float32) + attn + bo_ref[...]
        mu = jnp.mean(x, axis=-1, keepdims=True)
        xc = x - mu
        var = jnp.mean(xc * xc, axis=-1, keepdims=True)
        y = xc * lax.rsqrt(var + 1e-5)
        y = y * lnw_ref[...] + lnb_ref[...]
        out_ref[0] = y.astype(out_ref.dtype)

    return kernel


def _const_spec(shape):
    """Constant-index (weight) block; single-buffered when supported."""
    idx = lambda b, qi: (0,) * len(shape)
    buffered = getattr(pl, "Buffered", None)
    if buffered is not None:
        try:
            return pl.BlockSpec(shape, idx, pipeline_mode=buffered(1))
        except TypeError:
            pass
    return pl.BlockSpec(shape, idx)


def cross_attention_layer(tgt, memory, query_pos, pos, params, *, nhead,
                          block_q=None):
    """Pallas forward of CrossAttentionLayer.forward_post (dropout=0)."""
    B, Lq, D = tgt.shape
    _, Lk, _ = memory.shape
    assert D % nhead == 0
    hd = D // nhead
    cdt = tgt.dtype                    # activation / MXU compute dtype

    if block_q is None:
        block_q = min(Lq, 256)
    n_qblk = pl.cdiv(Lq, block_q)

    # ---- weight prep (cheap XLA-side reshapes/casts, outside the kernel) ----
    # torch: y = x @ W^T + b  ->  kernel uses packed W^T, cast to compute dtype
    # so bf16 activations give a bf16 x bf16 MXU path.
    wqT = params["wq"].T.astype(cdt)
    wkT = params["wk"].T.astype(cdt)
    wvT = params["wv"].T.astype(cdt)
    woT = params["wo"].T.astype(cdt)
    # Biases / LayerNorm params stay f32: they feed f32 accumulators/epilogue.
    bq = params["bq"].reshape(1, D).astype(jnp.float32)
    bk = params["bk"].reshape(1, D).astype(jnp.float32)
    bv = params["bv"].reshape(1, D).astype(jnp.float32)
    bo = params["bo"].reshape(1, D).astype(jnp.float32)
    lnw = params["ln_w"].reshape(1, D).astype(jnp.float32)
    lnb = params["ln_b"].reshape(1, D).astype(jnp.float32)

    kernel = _make_kernel(nhead, hd, D, block_q, Lk)

    q_spec = pl.BlockSpec((1, block_q, D), lambda b, qi: (b, qi, 0))
    kv_spec = pl.BlockSpec((1, Lk, D), lambda b, qi: (b, 0, 0))
    w_spec = _const_spec((D, D))
    vec_spec = _const_spec((1, D))

    # ---- generation-aware VMEM budget (hint) --------------------------------
    try:
        cap = int(getattr(pltpu.get_tpu_info(), "vmem_capacity_bytes", 64 << 20))
    except Exception:
        cap = 64 << 20                 # conservative (v7x per-TC) fallback
    lane = 128
    hd_pad = ((hd + lane - 1) // lane) * lane         # lane padding of hd tiles
    bpe = jnp.dtype(cdt).itemsize
    act_blk = bpe * D * (3 * block_q + 2 * Lk)        # tiled in/out blocks
    w_res = bpe * 4 * D * D + 4 * 6 * D               # single-buffered weights
    scr = 2 * bpe * nhead * Lk * hd_pad               # head-split K/V scratch
    inter = 4 * (nhead * block_q * (2 * Lk + 2 * hd_pad) + 6 * block_q * D)
    vmem_limit = 2 * act_blk + w_res + scr + inter + (8 << 20)
    vmem_limit = int(max(32 << 20, min(vmem_limit, int(cap * 0.85))))

    return pl.pallas_call(
        kernel,
        out_shape=jax.ShapeDtypeStruct((B, Lq, D), tgt.dtype),
        grid=(B, n_qblk),
        in_specs=[
            q_spec,                          # tgt
            kv_spec,                         # memory
            q_spec,                          # query_pos
            kv_spec,                         # pos
            w_spec, w_spec, w_spec, w_spec,  # Wq^T, Wk^T, Wv^T, Wo^T (packed)
            vec_spec, vec_spec, vec_spec, vec_spec,   # bq, bk, bv, bo
            vec_spec, vec_spec,              # ln_w, ln_b
        ],
        out_specs=q_spec,
        scratch_shapes=[
            pltpu.VMEM((nhead, Lk, hd), cdt),   # K (head-split), per batch elem
            pltpu.VMEM((nhead, Lk, hd), cdt),   # V (head-split), per batch elem
        ],
        # qi axis carries the K/V scratch -> must be sequential ("arbitrary").
        compiler_params=pltpu.CompilerParams(
            dimension_semantics=("parallel", "arbitrary"),
            vmem_limit_bytes=vmem_limit),
    )(tgt, memory, query_pos, pos,
      wqT, wkT, wvT, woT, bq, bk, bv, bo, lnw, lnb)


def _reference(tgt, memory, query_pos, pos, params, *, nhead):
    """Pure-JAX reference matching nn.MultiheadAttention(batch_first=True)."""
    B, Lq, D = tgt.shape
    _, Lk, _ = memory.shape
    hd = D // nhead
    q_in = tgt + query_pos
    k_in = memory + pos
    v_in = memory
    q = q_in @ params["wq"].T + params["bq"]
    k = k_in @ params["wk"].T + params["bk"]
    v = v_in @ params["wv"].T + params["bv"]
    q = q.reshape(B, Lq, nhead, hd).transpose(0, 2, 1, 3)
    k = k.reshape(B, Lk, nhead, hd).transpose(0, 2, 1, 3)
    v = v.reshape(B, Lk, nhead, hd).transpose(0, 2, 1, 3)
    s = jnp.einsum("bhqd,bhkd->bhqk", q, k) / math.sqrt(hd)
    p = jax.nn.softmax(s, axis=-1)
    o = jnp.einsum("bhqk,bhkd->bhqd", p, v)
    o = o.transpose(0, 2, 1, 3).reshape(B, Lq, D)
    o = o @ params["wo"].T + params["bo"]
    x = tgt + o
    mu = jnp.mean(x, axis=-1, keepdims=True)
    var = jnp.mean((x - mu) ** 2, axis=-1, keepdims=True)
    y = (x - mu) / jnp.sqrt(var + 1e-5)
    return y * params["ln_w"] + params["ln_b"]


def _init_params(key, d_model):
    # Deterministic synthetic init: xavier-uniform-like weights, zero biases,
    # LayerNorm gamma=1 / beta=0 (module defaults).
    ks = jax.random.split(key, 4)
    bound = math.sqrt(6.0 / (d_model + d_model))
    mk = lambda k: jax.random.uniform(k, (d_model, d_model), jnp.float32,
                                      -bound, bound)
    return {
        "wq": mk(ks[0]), "wk": mk(ks[1]), "wv": mk(ks[2]), "wo": mk(ks[3]),
        "bq": jnp.zeros((d_model,), jnp.float32),
        "bk": jnp.zeros((d_model,), jnp.float32),
        "bv": jnp.zeros((d_model,), jnp.float32),
        "bo": jnp.zeros((d_model,), jnp.float32),
        "ln_w": jnp.ones((d_model,), jnp.float32),
        "ln_b": jnp.zeros((d_model,), jnp.float32),
    }


if __name__ == "__main__":
    B, Lq, Lk, D, NHEAD = 2, 8, 16, 32, 4

    key = jax.random.PRNGKey(0)
    k_tgt, k_mem, k_qp, k_kp, k_par = jax.random.split(key, 5)
    tgt = jax.random.normal(k_tgt, (B, Lq, D), jnp.float32)
    memory = jax.random.normal(k_mem, (B, Lk, D), jnp.float32)
    query_pos = jax.random.normal(k_qp, (B, Lq, D), jnp.float32)
    pos = jax.random.normal(k_kp, (B, Lk, D), jnp.float32)
    params = _init_params(k_par, D)

    out = cross_attention_layer(tgt, memory, query_pos, pos, params,
                                nhead=NHEAD)
    out = jax.block_until_ready(out)

    ref = _reference(tgt, memory, query_pos, pos, params, nhead=NHEAD)
    assert out.shape == (B, Lq, D)
    # Exact softmax reciprocal -> tight tolerance restored.
    max_err = float(jnp.max(jnp.abs(out - ref)))
    assert jnp.allclose(out, ref, atol=1e-4, rtol=1e-4), max_err

    print("KERNEL_OK")
</pallas_src>

<mosaic_0001>
module attributes {stable_mosaic.version = 11 : i64} {
  func.func @kernel(%arg0: i32, %arg1: i32, %arg2: memref<1x8x32xf32, #tpu.memory_space<vmem>>, %arg3: memref<1x16x32xf32, #tpu.memory_space<vmem>>, %arg4: memref<1x8x32xf32, #tpu.memory_space<vmem>>, %arg5: memref<1x16x32xf32, #tpu.memory_space<vmem>>, %arg6: memref<32x32xf32, #tpu.memory_space<vmem>>, %arg7: memref<32x32xf32, #tpu.memory_space<vmem>>, %arg8: memref<32x32xf32, #tpu.memory_space<vmem>>, %arg9: memref<32x32xf32, #tpu.memory_space<vmem>>, %arg10: memref<1x32xf32, #tpu.memory_space<vmem>>, %arg11: memref<1x32xf32, #tpu.memory_space<vmem>>, %arg12: memref<1x32xf32, #tpu.memory_space<vmem>>, %arg13: memref<1x32xf32, #tpu.memory_space<vmem>>, %arg14: memref<1x32xf32, #tpu.memory_space<vmem>>, %arg15: memref<1x32xf32, #tpu.memory_space<vmem>>, %arg16: memref<1x8x32xf32, #tpu.memory_space<vmem>>, %arg17: memref<4x16x8xf32, #tpu.memory_space<vmem>>, %arg18: memref<4x16x8xf32, #tpu.memory_space<vmem>>) attributes {dimension_semantics = [#tpu.dimension_semantics<parallel>, #tpu.dimension_semantics<arbitrary>], iteration_bounds = array<i64: 2, 1>, scalar_prefetch = 0 : i64, scratch_operands = 2 : i64, tpu.core_type = #tpu.core_type<tc>, window_params = [{transform_indices = @transform_0, window_bounds = array<i64: 1, 8, 32>}, {transform_indices = @transform_1, window_bounds = array<i64: 1, 16, 32>}, {transform_indices = @transform_2, window_bounds = array<i64: 1, 8, 32>}, {transform_indices = @transform_3, window_bounds = array<i64: 1, 16, 32>}, {pipeline_mode = #tpu.pipeline_mode<synchronous>, transform_indices = @transform_4, window_bounds = array<i64: 32, 32>}, {pipeline_mode = #tpu.pipeline_mode<synchronous>, transform_indices = @transform_5, window_bounds = array<i64: 32, 32>}, {pipeline_mode = #tpu.pipeline_mode<synchronous>, transform_indices = @transform_6, window_bounds = array<i64: 32, 32>}, {pipeline_mode = #tpu.pipeline_mode<synchronous>, transform_indices = @transform_7, window_bounds = array<i64: 32, 32>}, {pipeline_mode = #tpu.pipeline_mode<synchronous>, transform_indices = @transform_8, window_bounds = array<i64: 1, 32>}, {pipeline_mode = #tpu.pipeline_mode<synchronous>, transform_indices = @transform_9, window_bounds = array<i64: 1, 32>}, {pipeline_mode = #tpu.pipeline_mode<synchronous>, transform_indices = @transform_10, window_bounds = array<i64: 1, 32>}, {pipeline_mode = #tpu.pipeline_mode<synchronous>, transform_indices = @transform_11, window_bounds = array<i64: 1, 32>}, {pipeline_mode = #tpu.pipeline_mode<synchronous>, transform_indices = @transform_12, window_bounds = array<i64: 1, 32>}, {pipeline_mode = #tpu.pipeline_mode<synchronous>, transform_indices = @transform_13, window_bounds = array<i64: 1, 32>}, {transform_indices = @transform_14, window_bounds = array<i64: 1, 8, 32>}]} {
    %c0_i32 = arith.constant 0 : i32
    %0 = arith.cmpi eq, %arg1, %c0_i32 : i32
    %1 = arith.extui %0 : i1 to i32
    %c0_i32_0 = arith.constant 0 : i32
    %2 = arith.cmpi ne, %1, %c0_i32_0 : i32
    scf.if %2 {
      %c0_38 = arith.constant 0 : index
      %c0_39 = arith.constant 0 : index
      %c0_40 = arith.constant 0 : index
      %63 = vector.load %arg3[%c0_38, %c0_39, %c0_40] : memref<1x16x32xf32, #tpu.memory_space<vmem>>, vector<1x16x32xf32>
      %64 = vector.shape_cast %63 : vector<1x16x32xf32> to vector<16x32xf32>
      %c0_41 = arith.constant 0 : index
      %c0_42 = arith.constant 0 : index
      %c0_43 = arith.constant 0 : index
      %65 = vector.load %arg5[%c0_41, %c0_42, %c0_43] : memref<1x16x32xf32, #tpu.memory_space<vmem>>, vector<1x16x32xf32>
      %66 = vector.shape_cast %65 : vector<1x16x32xf32> to vector<16x32xf32>
      %67 = arith.addf %64, %66 : vector<16x32xf32>
      %c0_44 = arith.constant 0 : index
      %c0_45 = arith.constant 0 : index
      %68 = vector.load %arg7[%c0_44, %c0_45] : memref<32x32xf32, #tpu.memory_space<vmem>>, vector<32x32xf32>
      %cst_46 = arith.constant dense<0.000000e+00> : vector<16x32xf32>
      %69 = tpu.matmul %67, %68, %cst_46 {dimension_numbers = #tpu.dot_dimension_numbers<[1], [0], [0], [1], [0, 0, 1, 1], [], []>} : vector<16x32xf32>, vector<32x32xf32>, vector<16x32xf32> -> vector<16x32xf32>
      %c0_47 = arith.constant 0 : index
      %c0_48 = arith.constant 0 : index
      %70 = vector.load %arg11[%c0_47, %c0_48] : memref<1x32xf32, #tpu.memory_space<vmem>>, vector<1x32xf32>
      %71 = vector.broadcast %70 : vector<1x32xf32> to vector<16x32xf32>
      %72 = arith.addf %69, %71 : vector<16x32xf32>
      %c0_49 = arith.constant 0 : index
      %c0_50 = arith.constant 0 : index
      %73 = vector.load %arg8[%c0_49, %c0_50] : memref<32x32xf32, #tpu.memory_space<vmem>>, vector<32x32xf32>
      %cst_51 = arith.constant dense<0.000000e+00> : vector<16x32xf32>
      %74 = tpu.matmul %64, %73, %cst_51 {dimension_numbers = #tpu.dot_dimension_numbers<[1], [0], [0], [1], [0, 0, 1, 1], [], []>} : vector<16x32xf32>, vector<32x32xf32>, vector<16x32xf32> -> vector<16x32xf32>
      %c0_52 = arith.constant 0 : index
      %c0_53 = arith.constant 0 : index
      %75 = vector.load %arg12[%c0_52, %c0_53] : memref<1x32xf32, #tpu.memory_space<vmem>>, vector<1x32xf32>
      %76 = vector.broadcast %75 : vector<1x32xf32> to vector<16x32xf32>
      %77 = arith.addf %74, %76 : vector<16x32xf32>
      %78 = vector.shape_cast %72 : vector<16x32xf32> to vector<16x4x8xf32>
      %79 = tpu.transpose %78, [1, 0, 2] : vector<16x4x8xf32> -> vector<4x16x8xf32>
      %c0_54 = arith.constant 0 : index
      %c0_55 = arith.constant 0 : index
      %c0_56 = arith.constant 0 : index
      %80 = vector.load %arg17[%c0_54, %c0_55, %c0_56] : memref<4x16x8xf32, #tpu.memory_space<vmem>>, vector<4x16x8xf32>
      tpu.vector_store %arg17[%c0_54, %c0_55, %c0_56], %79 {strides = array<i32>} : memref<4x16x8xf32, #tpu.memory_space<vmem>>, vector<4x16x8xf32>,
      %81 = vector.shape_cast %77 : vector<16x32xf32> to vector<16x4x8xf32>
      %82 = tpu.transpose %81, [1, 0, 2] : vector<16x4x8xf32> -> vector<4x16x8xf32>
      %c0_57 = arith.constant 0 : index
      %c0_58 = arith.constant 0 : index
      %c0_59 = arith.constant 0 : index
      %83 = vector.load %arg18[%c0_57, %c0_58, %c0_59] : memref<4x16x8xf32, #tpu.memory_space<vmem>>, vector<4x16x8xf32>
      tpu.vector_store %arg18[%c0_57, %c0_58, %c0_59], %82 {strides = array<i32>} : memref<4x16x8xf32, #tpu.memory_space<vmem>>, vector<4x16x8xf32>,
    } else {
    }
    %c0 = arith.constant 0 : index
    %c0_1 = arith.constant 0 : index
    %c0_2 = arith.constant 0 : index
    %3 = vector.load %arg2[%c0, %c0_1, %c0_2] : memref<1x8x32xf32, #tpu.memory_space<vmem>>, vector<1x8x32xf32>
    %4 = vector.shape_cast %3 : vector<1x8x32xf32> to vector<8x32xf32>
    %c0_3 = arith.constant 0 : index
    %c0_4 = arith.constant 0 : index
    %c0_5 = arith.constant 0 : index
    %5 = vector.load %arg4[%c0_3, %c0_4, %c0_5] : memref<1x8x32xf32, #tpu.memory_space<vmem>>, vector<1x8x32xf32>
    %6 = vector.shape_cast %5 : vector<1x8x32xf32> to vector<8x32xf32>
    %7 = arith.addf %4, %6 : vector<8x32xf32>
    %c0_6 = arith.constant 0 : index
    %c0_7 = arith.constant 0 : index
    %8 = vector.load %arg6[%c0_6, %c0_7] : memref<32x32xf32, #tpu.memory_space<vmem>>, vector<32x32xf32>
    %cst = arith.constant dense<0.000000e+00> : vector<8x32xf32>
    %9 = tpu.matmul %7, %8, %cst {dimension_numbers = #tpu.dot_dimension_numbers<[1], [0], [0], [1], [0, 0, 1, 1], [], []>} : vector<8x32xf32>, vector<32x32xf32>, vector<8x32xf32> -> vector<8x32xf32>
    %c0_8 = arith.constant 0 : index
    %c0_9 = arith.constant 0 : index
    %10 = vector.load %arg10[%c0_8, %c0_9] : memref<1x32xf32, #tpu.memory_space<vmem>>, vector<1x32xf32>
    %11 = vector.broadcast %10 : vector<1x32xf32> to vector<8x32xf32>
    %12 = arith.addf %9, %11 : vector<8x32xf32>
    %cst_10 = arith.constant 0.353553385 : f32
    %13 = vector.broadcast %cst_10 : f32 to vector<8x32xf32>
    %14 = arith.mulf %12, %13 : vector<8x32xf32>
    %15 = vector.shape_cast %14 : vector<8x32xf32> to vector<8x4x8xf32>
    %16 = tpu.transpose %15, [1, 0, 2] : vector<8x4x8xf32> -> vector<4x8x8xf32>
    %c0_11 = arith.constant 0 : index
    %c0_12 = arith.constant 0 : index
    %c0_13 = arith.constant 0 : index
    %17 = vector.load %arg17[%c0_11, %c0_12, %c0_13] : memref<4x16x8xf32, #tpu.memory_space<vmem>>, vector<4x16x8xf32>
    %cst_14 = arith.constant dense<0.000000e+00> : vector<4x8x16xf32>
    %18 = tpu.matmul %16, %17, %cst_14 {dimension_numbers = #tpu.dot_dimension_numbers<[2], [2], [1], [1], [0, 0, 0, 1, 1, 1], [0], [0]>} : vector<4x8x8xf32>, vector<4x16x8xf32>, vector<4x8x16xf32> -> vector<4x8x16xf32>
    %cst_15 = arith.constant dense<0xFF800000> : vector<4x8xf32>
    %19 = vector.multi_reduction <maximumf>, %18, %cst_15 [2] : vector<4x8x16xf32> to vector<4x8xf32>
    %20 = vector.shape_cast %19 : vector<4x8xf32> to vector<4x8x1xf32>
    %21 = vector.broadcast %20 : vector<4x8x1xf32> to vector<4x8x16xf32>
    %22 = arith.subf %18, %21 : vector<4x8x16xf32>
    %23 = math.exp %22 : vector<4x8x16xf32>
    %cst_16 = arith.constant dense<0.000000e+00> : vector<4x8xf32>
    %24 = vector.multi_reduction <add>, %23, %cst_16 [2] : vector<4x8x16xf32> to vector<4x8xf32>
    %25 = vector.shape_cast %24 : vector<4x8xf32> to vector<4x8x1xf32>
    %26 = vector.broadcast %25 : vector<4x8x1xf32> to vector<4x8x16xf32>
    %27 = arith.divf %23, %26 : vector<4x8x16xf32>
    %c0_17 = arith.constant 0 : index
    %c0_18 = arith.constant 0 : index
    %c0_19 = arith.constant 0 : index
    %28 = vector.load %arg18[%c0_17, %c0_18, %c0_19] : memref<4x16x8xf32, #tpu.memory_space<vmem>>, vector<4x16x8xf32>
    %cst_20 = arith.constant dense<0.000000e+00> : vector<4x8x8xf32>
    %29 = tpu.matmul %27, %28, %cst_20 {dimension_numbers = #tpu.dot_dimension_numbers<[2], [1], [1], [2], [0, 0, 0, 1, 1, 2], [0], [0]>} : vector<4x8x16xf32>, vector<4x16x8xf32>, vector<4x8x8xf32> -> vector<4x8x8xf32>
    %30 = tpu.transpose %29, [1, 0, 2] : vector<4x8x8xf32> -> vector<8x4x8xf32>
    %31 = vector.shape_cast %30 : vector<8x4x8xf32> to vector<8x32xf32>
    %c0_21 = arith.constant 0 : index
    %c0_22 = arith.constant 0 : index
    %32 = vector.load %arg9[%c0_21, %c0_22] : memref<32x32xf32, #tpu.memory_space<vmem>>, vector<32x32xf32>
    %cst_23 = arith.constant dense<0.000000e+00> : vector<8x32xf32>
    %33 = tpu.matmul %31, %32, %cst_23 {dimension_numbers = #tpu.dot_dimension_numbers<[1], [0], [0], [1], [0, 0, 1, 1], [], []>} : vector<8x32xf32>, vector<32x32xf32>, vector<8x32xf32> -> vector<8x32xf32>
    %34 = arith.addf %4, %33 : vector<8x32xf32>
    %c0_24 = arith.constant 0 : index
    %c0_25 = arith.constant 0 : index
    %35 = vector.load %arg13[%c0_24, %c0_25] : memref<1x32xf32, #tpu.memory_space<vmem>>, vector<1x32xf32>
    %36 = vector.broadcast %35 : vector<1x32xf32> to vector<8x32xf32>
    %37 = arith.addf %34, %36 : vector<8x32xf32>
    %cst_26 = arith.constant dense<0.000000e+00> : vector<8xf32>
    %38 = vector.multi_reduction <add>, %37, %cst_26 [1] : vector<8x32xf32> to vector<8xf32>
    %39 = vector.shape_cast %38 : vector<8xf32> to vector<8x1xf32>
    %cst_27 = arith.constant 3.200000e+01 : f32
    %40 = vector.broadcast %cst_27 : f32 to vector<8x1xf32>
    %41 = arith.divf %39, %40 : vector<8x1xf32>
    %42 = vector.broadcast %41 : vector<8x1xf32> to vector<8x32xf32>
    %43 = arith.subf %37, %42 : vector<8x32xf32>
    %44 = arith.mulf %43, %43 : vector<8x32xf32>
    %cst_28 = arith.constant dense<0.000000e+00> : vector<8xf32>
    %45 = vector.multi_reduction <add>, %44, %cst_28 [1] : vector<8x32xf32> to vector<8xf32>
    %46 = vector.shape_cast %45 : vector<8xf32> to vector<8x1xf32>
    %cst_29 = arith.constant 3.200000e+01 : f32
    %47 = vector.broadcast %cst_29 : f32 to vector<8x1xf32>
    %48 = arith.divf %46, %47 : vector<8x1xf32>
    %cst_30 = arith.constant 9.99999974E-6 : f32
    %49 = vector.broadcast %cst_30 : f32 to vector<8x1xf32>
    %50 = arith.addf %48, %49 : vector<8x1xf32>
    %51 = math.rsqrt %50 : vector<8x1xf32>
    %52 = vector.broadcast %51 : vector<8x1xf32> to vector<8x32xf32>
    %53 = arith.mulf %43, %52 : vector<8x32xf32>
    %c0_31 = arith.constant 0 : index
    %c0_32 = arith.constant 0 : index
    %54 = vector.load %arg14[%c0_31, %c0_32] : memref<1x32xf32, #tpu.memory_space<vmem>>, vector<1x32xf32>
    %55 = vector.broadcast %54 : vector<1x32xf32> to vector<8x32xf32>
    %56 = arith.mulf %53, %55 : vector<8x32xf32>
    %c0_33 = arith.constant 0 : index
    %c0_34 = arith.constant 0 : index
    %57 = vector.load %arg15[%c0_33, %c0_34] : memref<1x32xf32, #tpu.memory_space<vmem>>, vector<1x32xf32>
    %58 = vector.broadcast %57 : vector<1x32xf32> to vector<8x32xf32>
    %59 = arith.addf %56, %58 : vector<8x32xf32>
    %c0_35 = arith.constant 0 : index
    %c0_36 = arith.constant 0 : index
    %c0_37 = arith.constant 0 : index
    %60 = vector.load %arg16[%c0_35, %c0_36, %c0_37] : memref<1x8x32xf32, #tpu.memory_space<vmem>>, vector<1x8x32xf32>
    %61 = vector.shape_cast %60 : vector<1x8x32xf32> to vector<8x32xf32>
    %62 = vector.shape_cast %59 : vector<8x32xf32> to vector<1x8x32xf32>
    tpu.vector_store %arg16[%c0_35, %c0_36, %c0_37], %62 {strides = array<i32>} : memref<1x8x32xf32, #tpu.memory_space<vmem>>, vector<1x8x32xf32>,
    return
  }
  func.func @transform_0(%arg0: i32, %arg1: i32) -> (i32, i32, i32) {
    %c0_i32 = arith.constant 0 : i32
    %c0_i32_0 = arith.constant 0 : i32
    return %arg0, %arg1, %c0_i32 : i32, i32, i32
  }
  func.func @transform_1(%arg0: i32, %arg1: i32) -> (i32, i32, i32) {
    %c0_i32 = arith.constant 0 : i32
    %c0_i32_0 = arith.constant 0 : i32
    %c0_i32_1 = arith.constant 0 : i32
    return %arg0, %c0_i32, %c0_i32_0 : i32, i32, i32
  }
  func.func @transform_2(%arg0: i32, %arg1: i32) -> (i32, i32, i32) {
    %c0_i32 = arith.constant 0 : i32
    %c0_i32_0 = arith.constant 0 : i32
    return %arg0, %arg1, %c0_i32 : i32, i32, i32
  }
  func.func @transform_3(%arg0: i32, %arg1: i32) -> (i32, i32, i32) {
    %c0_i32 = arith.constant 0 : i32
    %c0_i32_0 = arith.constant 0 : i32
    %c0_i32_1 = arith.constant 0 : i32
    return %arg0, %c0_i32, %c0_i32_0 : i32, i32, i32
  }
  func.func @transform_4(%arg0: i32, %arg1: i32) -> (i32, i32) {
    %c0_i32 = arith.constant 0 : i32
    %c0_i32_0 = arith.constant 0 : i32
    %c0_i32_1 = arith.constant 0 : i32
    return %c0_i32, %c0_i32_0 : i32, i32
  }
  func.func @transform_5(%arg0: i32, %arg1: i32) -> (i32, i32) {
    %c0_i32 = arith.constant 0 : i32
    %c0_i32_0 = arith.constant 0 : i32
    %c0_i32_1 = arith.constant 0 : i32
    return %c0_i32, %c0_i32_0 : i32, i32
  }
  func.func @transform_6(%arg0: i32, %arg1: i32) -> (i32, i32) {
    %c0_i32 = arith.constant 0 : i32
    %c0_i32_0 = arith.constant 0 : i32
    %c0_i32_1 = arith.constant 0 : i32
    return %c0_i32, %c0_i32_0 : i32, i32
  }
  func.func @transform_7(%arg0: i32, %arg1: i32) -> (i32, i32) {
    %c0_i32 = arith.constant 0 : i32
    %c0_i32_0 = arith.constant 0 : i32
    %c0_i32_1 = arith.constant 0 : i32
    return %c0_i32, %c0_i32_0 : i32, i32
  }
  func.func @transform_8(%arg0: i32, %arg1: i32) -> (i32, i32) {
    %c0_i32 = arith.constant 0 : i32
    %c0_i32_0 = arith.constant 0 : i32
    %c0_i32_1 = arith.constant 0 : i32
    return %c0_i32, %c0_i32_0 : i32, i32
  }
  func.func @transform_9(%arg0: i32, %arg1: i32) -> (i32, i32) {
    %c0_i32 = arith.constant 0 : i32
    %c0_i32_0 = arith.constant 0 : i32
    %c0_i32_1 = arith.constant 0 : i32
    return %c0_i32, %c0_i32_0 : i32, i32
  }
  func.func @transform_10(%arg0: i32, %arg1: i32) -> (i32, i32) {
    %c0_i32 = arith.constant 0 : i32
    %c0_i32_0 = arith.constant 0 : i32
    %c0_i32_1 = arith.constant 0 : i32
    return %c0_i32, %c0_i32_0 : i32, i32
  }
  func.func @transform_11(%arg0: i32, %arg1: i32) -> (i32, i32) {
    %c0_i32 = arith.constant 0 : i32
    %c0_i32_0 = arith.constant 0 : i32
    %c0_i32_1 = arith.constant 0 : i32
    return %c0_i32, %c0_i32_0 : i32, i32
  }
  func.func @transform_12(%arg0: i32, %arg1: i32) -> (i32, i32) {
    %c0_i32 = arith.constant 0 : i32
    %c0_i32_0 = arith.constant 0 : i32
    %c0_i32_1 = arith.constant 0 : i32
    return %c0_i32, %c0_i32_0 : i32, i32
  }
  func.func @transform_13(%arg0: i32, %arg1: i32) -> (i32, i32) {
    %c0_i32 = arith.constant 0 : i32
    %c0_i32_0 = arith.constant 0 : i32
    %c0_i32_1 = arith.constant 0 : i32
    return %c0_i32, %c0_i32_0 : i32, i32
  }
  func.func @transform_14(%arg0: i32, %arg1: i32) -> (i32, i32, i32) {
    %c0_i32 = arith.constant 0 : i32
    %c0_i32_0 = arith.constant 0 : i32
    return %arg0, %arg1, %c0_i32 : i32, i32, i32
  }
}

</mosaic_0001>

<bundles_post_ra>
// kernel: tpu_custom_call.1
= control target key start
LH: loop header
LB: loop body
LE: loop exit
PB: predicated region body
PF: predicated region fallthrough
CT: control target
= control target key end

     0   :  { %s4385_s0 = inlined_call_operand.hbm [shape: f32[2,8,32], index: 0, kind: input, shape index: {}]   ;;  %s4386_s1 = inlined_call_operand.hbm [shape: f32[2,16,32], index: 1, kind: input, shape index: {}]   ;;  %s4387_s2 = inlined_call_operand.hbm [shape: f32[2,8,32], index: 2, kind: input, shape index: {}]   ;;  %s4388_s3 = inlined_call_operand.hbm [shape: f32[2,16,32], index: 3, kind: input, shape index: {}]   ;;  %s4389_s4 = inlined_call_operand.hbm [shape: f32[32,32], index: 4, kind: input, shape index: {}]   ;;  %s4390_s5 = inlined_call_operand.hbm [shape: f32[32,32], index: 5, kind: input, shape index: {}]   ;;  %s4391_s6 = inlined_call_operand.hbm [shape: f32[32,32], index: 6, kind: input, shape index: {}]   ;;  %s4392_s7 = inlined_call_operand.hbm [shape: f32[32,32], index: 7, kind: input, shape index: {}]   ;;  %s4393_s8 = inlined_call_operand.vmem [shape: f32[1,32], index: 8, kind: input, shape index: {}]   ;;  %s4394_s9 = inlined_call_operand.vmem [shape: f32[1,32], index: 9, kind: input, shape index: {}]   ;;  %s4395_s10 = inlined_call_operand.vmem [shape: f32[1,32], index: 10, kind: input, shape index: {}]   ;;  %s4396_s11 = inlined_call_operand.vmem [shape: f32[1,32], index: 11, kind: input, shape index: {}]   ;;  %s4397_s12 = inlined_call_operand.vmem [shape: f32[1,32], index: 12, kind: input, shape index: {}]   ;;  %s4398_s13 = inlined_call_operand.vmem [shape: f32[1,32], index: 13, kind: input, shape index: {}]   ;;  %s4399_s14 = inlined_call_operand.hbm [shape: f32[2,8,32], index: 14, kind: output, shape index: {}]  }
   0x1   :  { %4431 = sst [smem:[#allocation36_spill]] %s4386_s1 }
   0x2   :  { %4432 = sst [smem:[#allocation37_spill]] %s4389_s4 }
   0x3   :  { %4433 = sst [smem:[#allocation38_spill]] %s4390_s5 }
   0x4   :  { %4434 = sst [smem:[#allocation39_spill]] %s4393_s8 }
   0x5   :  { %4435 = sst [smem:[#allocation40_spill]] %s4394_s9 }
   0x6   :  { %4436 = sst [smem:[#allocation41_spill]] %s4395_s10 }
   0x7   :  { %4437 = sst [smem:[#allocation42_spill]] %s4396_s11 }
   0x8   :  { %4438 = sst [smem:[#allocation43_spill]] %s4397_s12 }
   0x9   :  { %4439 = sst [smem:[#allocation44_spill]] %s4398_s13 }
   0xa   :  { %4440 = sst [smem:[#allocation45_spill]] %s4399_s14 }
   0xb   :  { %19 = vsyncpa [#allocation5], 0 }
   0xc   :  { %21 = vsyncpa [#allocation5 + $0x1], 0 }
   0xd   :  { %22 = vsyncpa [#allocation8], 0 }
   0xe   :  { %24 = vsyncpa [#allocation8 + $0x1], 0 }
   0xf   :  { %25 = vsyncpa [#allocation11], 0 }
  0x10   :  { %27 = vsyncpa [#allocation11 + $0x1], 0 }
  0x11   :  { %28 = vsyncpa [#allocation14], 0 }
  0x12   :  { %29 = vsyncpa [#allocation17], 0 }
  0x13   :  { %30 = vsyncpa [#allocation6], 0 }
  0x14   :  { %32 = vsyncpa [#allocation6 + $0x1], 0  ;;  %s3703_s29 = smov 0   ;;  %s3705_s30 = smov 0  }
  0x15   :  { %s3707_s15 = smov 0   ;;  %s3709_s16 = smov 0  }
  0x16   :  { %s3711_s17 = smov 0   ;;  %s3713_s18 = smov 0  }
  0x17 LB: > { %4441 = sst [smem:[#allocation26_spill]] %s3584_s29  ;;  %s3734_s19 = sadd.s32 4294967295, %s3604_s18   ;;  %s3604_s18 = sphi %s3713_s18, %s38_s18   ;;  %s3600_s17 = sphi %s3711_s17, %s4506_s17   ;;  %s3596_s16 = sphi %s3709_s16, %s4505_s16   ;;  %s3592_s15 = sphi %s3707_s15, %s4503_s15   ;;  %s3588_s30 = sphi %s3705_s30, %s4502_s30   ;;  %s3584_s29 = sphi %s3703_s29, %s4501_s29  }
  0x18   : > { %4442 = sst [smem:[#allocation27_spill]] %s3588_s30  ;;  %s2846_s20 = sadd.s32 4294967294, %s3604_s18  }
  0x19   : > { %4443 = sst [smem:[#allocation28_spill]] %s3592_s15  ;;  %p72_p0 = scmp.ne.s32.totalorder %s3588_s30, %s3584_s29 }
  0x1a   : > { %4444 = sst [smem:[#allocation29_spill]] %s3596_s16  ;;  %p4403_p1 = scmp.eq.s32.totalorder %s3734_s19, 0 }
  0x1b   : > { %4445 = sst [smem:[#allocation30_spill]] %s3734_s19  ;;  %p394_p3 = scmp.eq.s32.totalorder %s2846_s20, 1 }
  0x1c   : > { %p3743_p4 = por %p4403_p1, %p72_p0  ;;  %p2847_p5 = scmp.ge.s32.totalorder %s3604_s18, 1 }
  0x1d   : > { %p3748_p6 = por %p394_p3, %p72_p0  ;;  %p401_p7 = scmp.lt.s32.totalorder %s3604_s18, 3 }
  0x1e   : > { %s4446_s21 = scalar_select %p3743_p4, 1, 0 }
  0x1f   : > { %s4448_s22 = scalar_select %p3748_p6, 1, 0 }
  0x20   : > { %4447 = sst [smem:[#allocation31_spill]] %s4446_s21  ;;  %p3753_p8 = pnand %p2847_p5, %p401_p7 }
  0x21   : > { %4449 = sst [smem:[#allocation32_spill]] %s4448_s22  ;;  %s3606_s24 = smov [#allocation12]  }
  0x22   : > { %s4450_s23 = scalar_select %p3753_p8, 1, 0 }
  0x23   : > { %s413_s25 = sshll.u32 %s3606_s24, 4  ;;  %p3147_p9 = pneg %p3753_p8  ;;  %s3757_s25 = int_to_ptr.vmem [resolvable:$true] %s413_s25 }
  0x24   : > { %s3607_s27 = smov [#allocation13]   ;;  %s4452_s4 = sld [smem:[#allocation37_spill]] }
  0x25   : > { %p3764_p11 = pnand %p3147_p9, %p4403_p1  ;;  %s426_s28 = sshll.u32 %s3607_s27, 4  ;;  %s3768_s28 = int_to_ptr.vmem [resolvable:$true] %s426_s28 }
  0x27   : > { %s4451_s26 = scalar_select %p3764_p11, 1, 0 }
  0x28   : > { %p3778_p13 = pneg %p3764_p11 }
  0x2a   : > { %s3270_s29 = scalar_lea.hbm %s4452_s4, 512 }
  0x2b   : > { %p3271_p12 = scmp.ne.s32.totalorder %s4452_s4, %s3270_s29  ;;  %p3277_p5 = scmp.lt.u32.totalorder %s3270_s29, %s4452_s4 }
  0x2c   : > { %s4453_s13 = scalar_select %p3778_p13, 1, 0 }
  0x2d   : > { %p3273_p0 = pnand %p3778_p13, %p3271_p12 }
  0x2f   : > { %p3274_p3 = pneg %p3273_p0 }
  0x31   : > { %p3279_p7 = pnand %p3277_p5, %p3274_p3 }
  0x33   : > { %3282 = shalt.err (!%p3279_p7)
}
  0x34   : > { %s3283_s14 = scalar_lea.vmem %s3757_s25, 512  ;;  %p3291_p2 = scmp.lt.s32.totalorder %s3757_s25, %s3757_s25 }
  0x35   : > { %p3284_p9 = scmp.ne.s32.totalorder %s3757_s25, %s3283_s14  ;;  %p3292_p6 = scmp.lt.s32.totalorder %s3283_s14, %s3283_s14 }
  0x37   : > { %p3286_p10 = pnand %p3284_p9, %p3778_p13  ;;  %p3293_p12 = por %p3292_p6, %p3291_p2 }
  0x39   : > { %p3287_p1 = pneg %p3286_p10 }
  0x3b   : > { %p3294_p0 = pnand %p3293_p12, %p3287_p1 }
  0x3d   : > { %3297 = shalt.err (!%p3294_p0)
}
  0x3e   : > { %s4404_s22 = smov 128   ;;  %s4406_s12 = smov 8  }
  0x3f   : > { %3150 = dma.hbm_to_vmem [thread:$0]  (!%p3764_p11), %s4452_s4, 512, %s3757_s25, [#allocation11], %s4404_s22, %s4404_s22, %s4406_s12  }
  0x40   : > { %s4454_s5 = sld [smem:[#allocation38_spill]] }
  0x46   : > { %s3298_s14 = scalar_lea.hbm %s4454_s5, 512 }
  0x47   : > { %p3299_p1 = scmp.ne.s32.totalorder %s4454_s5, %s3298_s14  ;;  %p3305_p10 = scmp.lt.u32.totalorder %s3298_s14, %s4454_s5 }
  0x49   : > { %p3301_p2 = pnand %p3299_p1, %p3778_p13 }
  0x4b   : > { %p3302_p6 = pneg %p3301_p2 }
  0x4d   : > { %p3307_p3 = pnand %p3305_p10, %p3302_p6 }
  0x4f   : > { %3310 = shalt.err (!%p3307_p3)
}
  0x50   : > { %s3311_s25 = scalar_lea.vmem %s3768_s28, 512  ;;  %p3319_p12 = scmp.lt.s32.totalorder %s3768_s28, %s3768_s28 }
  0x51   : > { %p3312_p5 = scmp.ne.s32.totalorder %s3768_s28, %s3311_s25  ;;  %p3320_p0 = scmp.lt.s32.totalorder %s3311_s25, %s3311_s25 }
  0x53   : > { %p3314_p7 = pnand %p3312_p5, %p3778_p13  ;;  %p3321_p1 = por %p3320_p0, %p3319_p12 }
  0x55   : > { %p3315_p9 = pneg %p3314_p7 }
  0x57   : > { %p3322_p2 = pnand %p3321_p1, %p3315_p9 }
  0x59   : > { %3325 = shalt.err (!%p3322_p2)
}
  0x5a   : > { %3153 = dma.hbm_to_vmem [thread:$0]  (!%p3764_p11), %s4454_s5, 512, %s3768_s28, [#allocation14], %s4404_s22, %s4404_s22, %s4406_s12  }
  0x5b   : > { %s50_s11 = sadd.s32 1, %s3600_s17  ;;  %s59_s16 = sadd.s32 1, %s3592_s15 }
  0x5c   : > { %p52_p6 = scmp.ge.s32.totalorder %s50_s11, 2  ;;  %p66_p10 = scmp.ne.s32.totalorder %s3592_s15, %s3588_s30 }
  0x5d   : > { %p67_p3 = scmp.eq.s32.totalorder %s3604_s18, 0  ;;  %p3181_p5 = scmp.lt.s32.totalorder %s3604_s18, 2 }
  0x5e   : > { %s4508_s11 = smov (%p52_p6, %s50_s11), 0  ;;  %p4456_p9 = scmp.eq.s32.totalorder %s3734_s19, 1 }
  0x5f   : > { %4455 = sst [smem:[#allocation33_spill]] %s4508_s11  ;;  %p68_p7 = por %p67_p3, %p66_p10 }
  0x60   : > { %p3838_p12 = por %p4456_p9, %p66_p10  ;;  %s54_s28 = ssub.s32 %s3600_s17, %s4508_s11 }
  0x61   : > { %s3845_s20 = sand.u32 1, %s3592_s15   ;;  %p57_p0 = scmp.eq.s32.totalorder %s54_s28, 0 }
  0x62   : > { %s4457_s29 = scalar_select %p3838_p12, 1, 0 }
  0x63   : > { %p3847_p1 = pnand %p3181_p5, %p68_p7  ;;  %s4413_s27 = sand.u32 1, %s3604_s18  }
  0x64   : > { %4458 = sst [smem:[#allocation34_spill]] %s4457_s29  ;;  %s4409_s14 = sshll.u32 %s3845_s20, 4 }
  0x65   : > { %s4459_s24 = scalar_select %p3847_p1, 1, 0 }
  0x66   : > { %s3854_s25 = scalar_select %p57_p0, %s3592_s15, %s59_s16  }
  0x67   : > { %s4410_s8 = sshll.u32 %s3600_s17, 8  ;;  %s4461_s1 = sld [smem:[#allocation36_spill]] }
  0x68   : > { %4460 = sst [smem:[#allocation35_spill]] %s3854_s25  ;;  %s507_s28 = scalar_lea.vmem [#allocation7], %s4409_s14 }
  0x69   : > { %s514_s4 = sshll.u32 %s507_s28, 4  ;;  %s3870_s5 = scalar_lea.sflag [#allocation8], %s4413_s27  ;;  %s3866_s4 = int_to_ptr.vmem [resolvable:$true] %s514_s4 }
  0x6a   : > { %p3876_p6 = pneg %p3847_p1 }
  0x6c   : > { %s4462_s11 = scalar_select %p3876_p6, 1, 0 }
  0x6d   : > { %s3862_s12 = scalar_lea.hbm %s4461_s1, %s4410_s8  ;;  %s3331_s28 = scalar_lea.hbm %s4461_s1, 512 }
  0x6e   : > { %s3326_s16 = scalar_lea.hbm %s3862_s12, 256  ;;  %p3332_p5 = scmp.lt.u32.totalorder %s3862_s12, %s4461_s1 }
  0x6f   : > { %p3327_p2 = scmp.ne.s32.totalorder %s3862_s12, %s3326_s16  ;;  %p3333_p7 = scmp.lt.u32.totalorder %s3331_s28, %s3326_s16 }
  0x70   : > { %p3335_p0 = scmp.lt.u32.totalorder %s3326_s16, %s3862_s12 }
  0x71   : > { %p3329_p10 = pnand %p3876_p6, %p3327_p2  ;;  %p3334_p9 = por %p3333_p7, %p3332_p5 }
  0x73   : > { %p3330_p3 = pneg %p3329_p10  ;;  %p3336_p12 = por %p3335_p0, %p3334_p9 }
  0x75   : > { %p3337_p4 = pnand %p3336_p12, %p3330_p3 }
  0x77   : > { %3340 = shalt.err (!%p3337_p4)
}
  0x78   : > { %s3341_s27 = scalar_lea.vmem %s3866_s4, 256  ;;  %s3610_s22 = smov [#allocation7]  }
  0x79   : > { %p3342_p2 = scmp.ne.s32.totalorder %s3866_s4, %s3341_s27  ;;  %s3346_s10 = sshll.u32 %s3610_s22, 4  ;;  %s3347_s10 = int_to_ptr.vmem [resolvable:$false] %s3346_s10 }
  0x7a   : > { %s3348_s14 = scalar_lea.vmem %s3347_s10, 512  ;;  %p3349_p11 = scmp.lt.s32.totalorder %s3866_s4, %s3347_s10 }
  0x7b   : > { %p3344_p10 = pnand %p3342_p2, %p3876_p6  ;;  %p3350_p13 = scmp.lt.s32.totalorder %s3348_s14, %s3341_s27 }
  0x7d   : > { %p3345_p8 = pneg %p3344_p10  ;;  %p3351_p5 = por %p3350_p13, %p3349_p11 }
  0x7f   : > { %p3352_p7 = pnand %p3351_p5, %p3345_p8 }
  0x81   : > { %3355 = shalt.err (!%p3352_p7)
}
  0x82   : > { %s4463_s8 = smov 8   ;;  %s4464_s16 = smov 128  }
  0x83   : > { %3166 = dma.hbm_to_vmem [thread:$0]  (!%p3847_p1), %s3862_s12, 256, %s3866_s4, %s3870_s5, %s4464_s16, %s4464_s16, %s4463_s8  }
  0x84   : > { %s4465_s28 = sshll.u32 %s3600_s17, 8  ;;  %s4466_s10 = sshll.u32 %s3845_s20, 4 }
  0x85   : > { %s3908_s27 = scalar_lea.hbm %s4388_s3, %s4465_s28  ;;  %s547_s14 = scalar_lea.vmem [#allocation10], %s4466_s10 }
  0x86   : > { %s554_s25 = sshll.u32 %s547_s14, 4  ;;  %s3611_s15 = smov [#allocation15]   ;;  %s3912_s25 = int_to_ptr.vmem [resolvable:$true] %s554_s25 }
  0x87   : > { %s439_s29 = sshll.u32 %s3611_s15, 4  ;;  %s3356_s21 = scalar_lea.hbm %s4391_s6, 512  ;;  %s440_s29 = int_to_ptr.vmem [resolvable:$true] %s439_s29 }
  0x88   : > { %p3357_p4 = scmp.ne.s32.totalorder %s4391_s6, %s3356_s21  ;;  %p4467_p8 = scmp.ne.s32.totalorder %s4453_s13, 0 }
  0x89   : > { %p3363_p12 = scmp.lt.u32.totalorder %s3356_s21, %s4391_s6 }
  0x8a   : > { %p3359_p11 = pnand %p3357_p4, %p4467_p8 }
  0x8c   : > { %p3360_p13 = pneg %p3359_p11 }
  0x8e   : > { %p3365_p3 = pnand %p3363_p12, %p3360_p13 }
  0x90   : > { %3368 = shalt.err (!%p3365_p3)
}
  0x91   : > { %s3369_s28 = scalar_lea.vmem %s440_s29, 512  ;;  %p3377_p10 = scmp.lt.s32.totalorder %s440_s29, %s440_s29 }
  0x92   : > { %p3370_p9 = scmp.ne.s32.totalorder %s440_s29, %s3369_s28  ;;  %p3378_p5 = scmp.lt.s32.totalorder %s3369_s28, %s3369_s28 }
  0x94   : > { %p3372_p0 = pnand %p3370_p9, %p4467_p8  ;;  %p3379_p7 = por %p3378_p5, %p3377_p10 }
  0x96   : > { %p3373_p2 = pneg %p3372_p0 }
  0x98   : > { %p3380_p1 = pnand %p3379_p7, %p3373_p2 }
  0x9a   : > { %3383 = shalt.err (!%p3380_p1)
}
  0x9b   : > { %p4468_p4 = scmp.ne.s32.totalorder %s4451_s26, 0  ;;  %s3612_s15 = smov [#allocation16]  }
  0x9c   : > { %s452_s19 = sshll.u32 %s3612_s15, 4  ;;  %s2853_s21 = sshll.u32 %s3845_s20, 3  ;;  %s453_s19 = int_to_ptr.vmem [resolvable:$true] %s452_s19 }
  0x9d   : > { %3156 = dma.hbm_to_vmem [thread:$0]  (!%p4468_p4), %s4391_s6, 512, %s440_s29, [#allocation14], %s4464_s16, %s4464_s16, %s4463_s8  }
  0x9e   : > { %s3384_s14 = scalar_lea.hbm %s4392_s7, 512 }
  0x9f   : > { %p3385_p1 = scmp.ne.s32.totalorder %s4392_s7, %s3384_s14  ;;  %p3391_p12 = scmp.lt.u32.totalorder %s3384_s14, %s4392_s7 }
  0xa1   : > { %p3387_p11 = pnand %p3385_p1, %p4467_p8 }
  0xa3   : > { %p3388_p13 = pneg %p3387_p11 }
  0xa5   : > { %p3393_p3 = pnand %p3391_p12, %p3388_p13 }
  0xa7   : > { %3396 = shalt.err (!%p3393_p3)
}
  0xa8   : > { %s3397_s29 = scalar_lea.vmem %s453_s19, 512  ;;  %p3405_p10 = scmp.lt.s32.totalorder %s453_s19, %s453_s19 }
  0xa9   : > { %p3398_p9 = scmp.ne.s32.totalorder %s453_s19, %s3397_s29  ;;  %p3406_p5 = scmp.lt.s32.totalorder %s3397_s29, %s3397_s29 }
  0xab   : > { %p3400_p0 = pnand %p3398_p9, %p4467_p8  ;;  %p3407_p7 = por %p3406_p5, %p3405_p10 }
  0xad   : > { %p3401_p2 = pneg %p3400_p0 }
  0xaf   : > { %p3408_p6 = pnand %p3407_p7, %p3401_p2 }
  0xb1   : > { %3411 = shalt.err (!%p3408_p6)
}
  0xb2   : > { %3159 = dma.hbm_to_vmem [thread:$0]  (!%p4468_p4), %s4392_s7, 512, %s453_s19, [#allocation17], %s4464_s16, %s4464_s16, %s4463_s8  }
  0xb3   : > { %s2854_s13 = sshll.u32 %s3600_s17, 7  ;;  %s488_s26 = scalar_lea.vmem [#allocation4], %s2853_s21 }
  0xb4   : > { %s3963_s10 = scalar_lea.hbm %s4385_s0, %s2854_s13  ;;  %s496_s14 = sshll.u32 %s488_s26, 4  ;;  %s497_s14 = int_to_ptr.vmem [resolvable:$true] %s496_s14 }
  0xb5   : > { %s485_s4 = scalar_lea.sflag [#allocation5], %s3845_s20  ;;  %s3412_s1 = scalar_lea.hbm %s3963_s10, 128 }
  0xb6   : > { %p3413_p6 = scmp.ne.s32.totalorder %s3963_s10, %s3412_s1  ;;  %p4469_p8 = scmp.ne.s32.totalorder %s4462_s11, 0 }
  0xb7   : > { %s3417_s28 = scalar_lea.hbm %s4385_s0, 256  ;;  %p3418_p11 = scmp.lt.u32.totalorder %s3963_s10, %s4385_s0 }
  0xb8   : > { %p3415_p4 = pnand %p3413_p6, %p4469_p8  ;;  %p3419_p13 = scmp.lt.u32.totalorder %s3417_s28, %s3412_s1 }
  0xb9   : > { %p3421_p3 = scmp.lt.u32.totalorder %s3412_s1, %s3963_s10 }
  0xba   : > { %p3416_p1 = pneg %p3415_p4  ;;  %p3420_p12 = por %p3419_p13, %p3418_p11 }
  0xbc   : > { %p3422_p9 = por %p3421_p3, %p3420_p12 }
  0xbe   : > { %p3423_p0 = pnand %p3422_p9, %p3416_p1 }
  0xc0   : > { %3426 = shalt.err (!%p3423_p0)
}
  0xc1   : > { %s3427_s30 = scalar_lea.vmem %s497_s14, 128  ;;  %s3613_s15 = smov [#allocation4]  }
  0xc2   : > { %p3428_p2 = scmp.ne.s32.totalorder %s497_s14, %s3427_s30  ;;  %s3432_s22 = sshll.u32 %s3613_s15, 4  ;;  %s3433_s22 = int_to_ptr.vmem [resolvable:$false] %s3432_s22 }
  0xc3   : > { %s3434_s26 = scalar_lea.vmem %s3433_s22, 256  ;;  %p3435_p7 = scmp.lt.s32.totalorder %s497_s14, %s3433_s22 }
  0xc4   : > { %p3430_p10 = pnand %p3428_p2, %p4469_p8  ;;  %p3436_p6 = scmp.lt.s32.totalorder %s3434_s26, %s3427_s30 }
  0xc6   : > { %p3431_p5 = pneg %p3430_p10  ;;  %p3437_p4 = por %p3436_p6, %p3435_p7 }
  0xc8   : > { %p3438_p11 = pnand %p3437_p4, %p3431_p5 }
  0xca   : > { %3441 = shalt.err (!%p3438_p11)
}
  0xcb   : > { %p4470_p13 = scmp.ne.s32.totalorder %s4459_s24, 0  ;;  %s3990_s12 = scalar_lea.hbm %s4387_s2, %s2854_s13 }
  0xcc   : > { %s528_s28 = scalar_lea.vmem [#allocation9], %s2853_s21  ;;  %s3442_s9 = scalar_lea.hbm %s3990_s12, 128 }
  0xcd   : > { %3163 = dma.hbm_to_vmem [thread:$0]  (!%p4470_p13), %s3963_s10, 128, %s497_s14, %s485_s4  }
  0xce   : > { %s536_s29 = sshll.u32 %s528_s28, 4  ;;  %p3443_p1 = scmp.ne.s32.totalorder %s3990_s12, %s3442_s9  ;;  %s537_s29 = int_to_ptr.vmem [resolvable:$true] %s536_s29 }
  0xcf   : > { %s3447_s4 = scalar_lea.hbm %s4387_s2, 256  ;;  %p3448_p9 = scmp.lt.u32.totalorder %s3990_s12, %s4387_s2 }
  0xd0   : > { %p3445_p12 = pnand %p3443_p1, %p4469_p8  ;;  %p3449_p0 = scmp.lt.u32.totalorder %s3447_s4, %s3442_s9 }
  0xd1   : > { %p3451_p10 = scmp.lt.u32.totalorder %s3442_s9, %s3990_s12 }
  0xd2   : > { %p3446_p3 = pneg %p3445_p12  ;;  %p3450_p2 = por %p3449_p0, %p3448_p9 }
  0xd4   : > { %p3452_p5 = por %p3451_p10, %p3450_p2 }
  0xd6   : > { %p3453_p7 = pnand %p3452_p5, %p3446_p3 }
  0xd8   : > { %3456 = shalt.err (!%p3453_p7)
}
  0xd9   : > { %s3457_s20 = scalar_lea.vmem %s537_s29, 128  ;;  %s3614_s21 = smov [#allocation9]  }
  0xda   : > { %p3458_p6 = scmp.ne.s32.totalorder %s537_s29, %s3457_s20  ;;  %s3462_s15 = sshll.u32 %s3614_s21, 4  ;;  %s3463_s15 = int_to_ptr.vmem [resolvable:$false] %s3462_s15 }
  0xdb   : > { %s3464_s22 = scalar_lea.vmem %s3463_s15, 256  ;;  %p3465_p1 = scmp.lt.s32.totalorder %s537_s29, %s3463_s15 }
  0xdc   : > { %p3460_p4 = pnand %p3458_p6, %p4469_p8  ;;  %p3466_p12 = scmp.lt.s32.totalorder %s3464_s22, %s3457_s20 }
  0xde   : > { %p3461_p11 = pneg %p3460_p4  ;;  %p3467_p13 = por %p3466_p12, %p3465_p1 }
  0xe0   : > { %p3468_p0 = pnand %p3467_p13, %p3461_p11 }
  0xe2   : > { %3471 = shalt.err (!%p3468_p0)
}
  0xe3   : > { %p4471_p9 = scmp.ne.s32.totalorder %s4459_s24, 0  ;;  %s4472_s26 = sand.u32 1, %s3604_s18  }
  0xe4   : > { %s4014_s1 = scalar_lea.sflag [#allocation11], %s4472_s26  ;;  %s3472_s19 = scalar_lea.hbm %s3908_s27, 256 }
  0xe5   : > { %3169 = dma.hbm_to_vmem [thread:$0]  (!%p4471_p9), %s3990_s12, 128, %s537_s29, %s3870_s5  }
  0xe6   : > { %p3473_p3 = scmp.ne.s32.totalorder %s3908_s27, %s3472_s19  ;;  %s3477_s10 = scalar_lea.hbm %s4388_s3, 512 }
  0xe7   : > { %p3478_p10 = scmp.lt.u32.totalorder %s3908_s27, %s4388_s3  ;;  %p3479_p5 = scmp.lt.u32.totalorder %s3477_s10, %s3472_s19 }
  0xe8   : > { %p3475_p2 = pnand %p3473_p3, %p4469_p8  ;;  %p3481_p6 = scmp.lt.u32.totalorder %s3472_s19, %s3908_s27 }
  0xe9   : > { %p3480_p7 = por %p3479_p5, %p3478_p10 }
  0xea   : > { %p3476_p13 = pneg %p3475_p2 }
  0xeb   : > { %p3482_p4 = por %p3481_p6, %p3480_p7 }
  0xed   : > { %p3483_p11 = pnand %p3482_p4, %p3476_p13 }
  0xef   : > { %3486 = shalt.err (!%p3483_p11)
}
  0xf0   : > { %s3487_s5 = scalar_lea.vmem %s3912_s25, 256  ;;  %s3615_s12 = smov [#allocation10]  }
  0xf1   : > { %p3488_p1 = scmp.ne.s32.totalorder %s3912_s25, %s3487_s5  ;;  %s3492_s29 = sshll.u32 %s3615_s12, 4  ;;  %s3493_s29 = int_to_ptr.vmem [resolvable:$false] %s3492_s29 }
  0xf2   : > { %s3494_s30 = scalar_lea.vmem %s3493_s29, 512  ;;  %p3495_p3 = scmp.lt.s32.totalorder %s3912_s25, %s3493_s29 }
  0xf3   : > { %p3490_p12 = pnand %p3488_p1, %p4469_p8  ;;  %p3496_p2 = scmp.lt.s32.totalorder %s3494_s30, %s3487_s5 }
  0xf5   : > { %p3491_p0 = pneg %p3490_p12  ;;  %p3497_p10 = por %p3496_p2, %p3495_p3 }
  0xf7   : > { %p3498_p5 = pnand %p3497_p10, %p3491_p0 }
  0xf9   : > { %3501 = shalt.err (!%p3498_p5)
}
  0xfa   : > { %3172 = dma.hbm_to_vmem [thread:$0]  (!%p4471_p9), %s3908_s27, 256, %s3912_s25, %s4014_s1, %s4464_s16, %s4464_s16, %s4463_s8  }
  0xfb   : > { %p4473_p8 = scmp.ne.s32.totalorder %s4450_s23, 0 }
  0xfc   : > { %s4474_s11 = sld [smem:[#allocation27_spill]] (!%p4473_p8)  ;;  %s4475_s13 = sld [smem:[#allocation31_spill]] (!%p4473_p8) }
  0xfd   : > { %566 = sbr.rel (%p4473_p8) target bundleno = 2116 (0x844), region = 76 }
 0x102   : > { %s4044_s20 = sand.u32 (!%p4473_p8), 1, %s4474_s11   ;;  %p4476_p13 = scmp.ne.s32.totalorder (!%p4473_p8), %s4475_s13, 0 }
 0x103   : > { %s4047_s21 = sshll.u32 (!%p4473_p8), %s4044_s20, 3  ;;  %s569_s24 = scalar_lea.sflag (!%p4473_p8), [#allocation5], %s4044_s20 }
 0x104   : > { %s572_s15 = scalar_lea.vmem [#allocation4], %s4047_s21 }
 0x105   : > { %3555 = dma.done.wait (%p4476_p13), %s569_s24, 128  }
 0x106   : > { %3557 = vsyncadd (%p4476_p13), %s569_s24, 4294967168  ;;  %s4477_s25 = sld [smem:[#allocation30_spill]]  ;;  %s2865_s8 = sshll.u32 %s4044_s20, 4 }
 0x107   : > { %s581_s27 = scalar_lea.vmem [#allocation7], %s2865_s8 }
 0x10c   : > { %s577_s23 = sand.u32 1, %s4477_s25  }
 0x10d   : > { %s578_s16 = scalar_lea.sflag [#allocation8], %s577_s23 }
 0x10e   : > { %3559 = dma.done.wait (%p4476_p13), %s578_s16, 384  }
 0x10f   : > { %3561 = vsyncadd (%p4476_p13), %s578_s16, 4294966912  ;;  %s590_s22 = scalar_lea.vmem [#allocation9], %s4047_s21  ;;  %s596_s26 = scalar_lea.sflag [#allocation11], %s577_s23 }
 0x110   : > { %s599_s1 = scalar_lea.vmem [#allocation10], %s2865_s8 }
 0x111   : > { %3563 = dma.done.wait (%p4476_p13), %s596_s26, 256  }
 0x112   : > { %3565 = vsyncadd (%p4476_p13), %s596_s26, 4294967040  ;;  %p4478_p9 = scmp.eq.s32.totalorder %s4477_s25, 0 }
 0x114   : > { %3567 = dma.done.wait (%p4478_p9), [#allocation11], 512   ;;  %p4479_p7 = pmov %p4478_p9 }
 0x116   : > { %3569 = vsyncadd (%p4479_p7), [#allocation11], 4294966784  ;;  %p4480_p6 = pmov %p4479_p7 }
 0x118   : > { %3571 = dma.done.wait (%p4480_p6), [#allocation14], 1024   ;;  %p4481_p4 = pmov %p4480_p6 }
 0x11a   : > { %3573 = vsyncadd (%p4481_p4), [#allocation14], 4294966272  ;;  %p4482_p11 = pmov %p4481_p4 }
 0x11b   : > { %p4483_p1 = pmov %p4481_p4 }
 0x11c   : > { %3575 = dma.done.wait (%p4482_p11), [#allocation17], 512  }
 0x11d   : > { %3577 = vsyncadd (%p4483_p1), [#allocation17], 4294966784  ;;  %v685_v0 = vld [vmem:[#allocation13] sm:$0xff]  ;;  %v686_v1 = vld [vmem:[#allocation13 + $0x8] sm:$0xff]  ;;  %vm696_vm0 = vcmask 261120   ;;  %v3616_v15 = vmov 0.0|0.0   ;;  %v895_v41 = vlaneseq }
 0x11e   : > { %v687_v2 = vld [vmem:[#allocation13 + $0x10] sm:$0xff]  ;;  %v3065_v3 = vpack.c.bf16 %v686_v1, %v685_v0  ;;  %v688_v4 = vld [vmem:[#allocation13 + $0x18] sm:$0xff]  ;;  %v1474_v11 = vld [vmem:[#allocation12] sm:$0xff]  ;;  %vm3617_vm1 = vmmov 0   ;;  %v3618_v19 = vmov 0.0   ;;  %s4484_s9 = sld [smem:[#allocation40_spill]] }
 0x11f   : > { %v679_v5 = vld [vmem:[%s581_s27] sm:$0xff]  ;;  %v681_v6 = vld [vmem:[%s599_s1] sm:$0xff]  ;;  %v3069_v7 = vpack.c.bf16 %v688_v4, %v687_v2  ;;  %v680_v9 = vld [vmem:[%s581_s27 + $0x8] sm:$0xff]  ;;  %s3619_s10 = smov 112   ;;  %s3620_s14 = smov 120   ;;  %v896_v45 = vshrl.u32 %v895_v41, 7 }
 0x120   : > { %v683_v8 = vadd.f32 %v681_v6, %v679_v5  ;;  %2984 = vmatprep.mubr.msk.f32.mxu1 %vm696_vm0, %v679_v5  ;;  %3066 = vmatprep.subr.bf16.mxu0 %v3065_v3  ;;  %v682_v10 = vld [vmem:[%s599_s1 + $0x8] sm:$0xff]  ;;  %v1476_v16 = vld [vmem:[#allocation12 + $0x10] sm:$0xff]  ;;  %v4086_v20 = vld [vmem:[%s572_s15] sm:$0xff]  ;;  %s4485_s12 = sld [smem:[#allocation39_spill]]  ;;  %s3621_s29 = smov 104   ;;  %vm1162_vm2 = vcmask 64512  }
 0x121   : > { %3068 = vmatpush3.bf16.msra.mxu0 %v3065_v3  ;;  %v1475_v12 = vld [vmem:[#allocation12 + $0x8] sm:$0xff]  ;;  %v684_v13 = vadd.f32 %v682_v10, %v680_v9  ;;  %v1477_v17 = vld [vmem:[#allocation12 + $0x18] sm:$0xff]  ;;  %v778_v33 = vld [vmem:[#allocation15] sm:$0xff]  ;;  %v3622_v39 = vmov 1983009808   ;;  %vm2031_vm4 = vcmask 130048  }
 0x122   : > { %2973 = vmatprep.mubr.msk.f32.mxu0 %vm696_vm0, %v683_v8  ;;  %3070 = vmatprep.subr.bf16.mxu0 %v3069_v7  ;;  %v3082_v14 = vpack.c.bf16 %v1475_v12, %v1474_v11  ;;  %v3085_v18 = vpack.c.bf16 %v1477_v17, %v1476_v16  ;;  %v1472_v21 = vld [vmem:[%s590_s22] sm:$0xff]  ;;  %v779_v34 = vld [vmem:[#allocation15 + $0x8] sm:$0xff]  ;;  %v893_v40 = vunpack.c.l.s4 %v3622_v39  ;;  %v3623_v46 = vmov 1934713408   ;;  %vm4176_vm3 = vmpackc.low %vm1162_vm2, %vm1162_vm2  ;;  %s4488_s13 = sld [smem:[#allocation41_spill]]  ;;  %s3624_s24 = smov 16  }
 0x123   : > { %v1473_v22 = vadd.f32 %v1472_v21, %v4086_v20  ;;  %v3073_v35 = vpack.c.bf16 %v779_v34, %v778_v33  ;;  %v780_v36 = vld [vmem:[#allocation15 + $0x10] sm:$0xff]  ;;  %v781_v37 = vld [vmem:[#allocation15 + $0x18] sm:$0xff]  ;;  %v925_v47 = vunpack.c.l.s4 %v3623_v46  ;;  %s3625_s15 = smov 8   ;;  %s3626_s25 = smov 24   ;;  %vm2526_vm5 = vcmask 195584  }
 0x124   : > { %v2873_v23 = vld [vmem:[%s4484_s9] ss:$0 sm:$0xff]  ;;  %v3077_v38 = vpack.c.bf16 %v781_v37, %v780_v36  ;;  %v894_v44 = vunpack.c.0.s8 %v893_v40  ;;  %s4489_s16 = sld [smem:[#allocation42_spill]]  ;;  %s4490_s27 = sld [smem:[#allocation29_spill]] }
 0x125   : > { %3072 = vmatpush3.bf16.msra.mxu0 %v3069_v7  ;;  %3074 = vmatprep.subr.bf16.mxu1 %v3073_v35  ;;  %v926_v53 = vunpack.c.0.s8 %v925_v47  ;;  %s4491_s22 = sld [smem:[#allocation34_spill]]  ;;  %s4492_s19 = sld [smem:[#allocation43_spill]] }
 0x126   : > { %3081 = vmatprep.subr.bf16.mxu0 %v3616_v15  ;;  %v2887_v28 = vld [vmem:[%s4485_s12] ss:$0 sm:$0xff]  ;;  %3076 = vmatpush3.bf16.msra.mxu1 %v3073_v35  ;;  %v4120_v50 = vsub.s32 %v894_v44, %v896_v45  ;;  %s674_s4 = scalar_lea.vmem [#allocation18], %s4047_s21  ;;  %s4494_s30 = sld [smem:[#allocation45_spill]] }
 0x127   : > { %3078 = vmatprep.subr.bf16.mxu1 %v3077_v38  ;;  %v4124_v0 = vsub.s32 %v926_v53, %v896_v45  ;;  %s2660_s5 = sshll.u32 %s674_s4, 4  ;;  %s3627_s21 = smov [#allocation18]   ;;  %s4337_s5 = int_to_ptr.vmem [resolvable:$true] %s2660_s5 }
 0x128   : > { %2974 = vmatmul.mubr.msk.f32.vlgmr.msra.gmra.mrb[0].mxu0 %vm696_vm0, %v684_v13 }
 0x129   : > { %3083 = vmatpush3.bf16.msra.mxu0 %v3082_v14  ;;  %2995 = vmatprep.mubr.msk.f32.mxu0 %vm3617_vm1, %v3618_v19 }
 0x12a   : > { %3084 = vmatprep.subr.bf16.mxu0 %v3616_v15  ;;  %3080 = vmatpush3.bf16.msra.mxu1 %v3077_v38 }
 0x12b   : > { %3087 = vmatprep.subr.bf16.mxu1 %v3616_v15  ;;  %p4496_p0 = scmp.ne.s32.totalorder %s4491_s22, 0 }
 0x12c   : > { %s4495_s11 = smov %s4494_s30 }
 0x12d   : > { %3086 = vmatpush3.bf16.msra.mxu0 %v3085_v18  ;;  %2985 = vmatmul.mubr.msk.f32.vlgmr.msra.gmra.mrb[0].mxu1 %vm696_vm0, %v680_v9 }
 0x12e   : > { %3091 = vmatprep.subr.bf16.mxu0 %v3616_v15  ;;  %3002 = vmatprep.mubr.msk.f32.mxu1 %vm3617_vm1, %v3618_v19 }
 0x130   : > { %2996 = vmatmul.mubr.msk.f32.vlgmr.msra.gmra.mrb[2].mxu0 %vm696_vm0, %v1473_v22 }
 0x131   : > { %3009 = vmatprep.mubr.msk.f32.mxu0 %vm3617_vm1, %v3618_v19 }
 0x1fb   : > { %v2975_v24 = vpop.f32.mrb[0].mxu0 }
 0x1fc   : > { %v775_v25 = vadd.f32 %v2975_v24, %v2873_v23  ;;  %v769_v26 = vpop.f32.mrb[1].mxu0 }
 0x1fd   : > { %v770_v27 = vadd.f32 %v2873_v23, %v769_v26 }
 0x1fe   : > { %880 = vrot.lane.b32.xlu1 %v775_v25, %s3619_s10  ;;  %874 = vrot.lane.b32.xlu0 %v775_v25, %s3620_s14 }
 0x202   : > { %878 = vrot.lane.b32.xlu1 %v770_v27, %s3619_s10  ;;  %872 = vrot.lane.b32.xlu0 %v770_v27, %s3620_s14 }
 0x203   : > { %v1555_v29 = vpop.f32.mrb[2].mxu0 }
 0x204   : > { %v1556_v30 = vadd.f32 %v2887_v28, %v1555_v29  ;;  %v2997_v31 = vpop.f32.mrb[3].mxu0 }
 0x206   : > { %v4106_v32 = vmul.f32 0.35355338, %v1556_v30  ;;  %886 = vrot.lane.b32.xlu1 %v775_v25, %s3621_s29  ;;  %884 = vrot.lane.b32.xlu0 %v770_v27, %s3621_s29 }
 0x20a   : > { %1564 = vrot.lane.b32.xlu1 %v4106_v32, %s3619_s10  ;;  %1561 = vrot.lane.b32.xlu0 %v4106_v32, %s3620_s14 }
 0x20e   : > { %1567 = vrot.lane.b32.xlu0 %v4106_v32, %s3621_s29 }
 0x270   : > { %v881_v42 = vpop.permute.xlu1 %880  ;;  %v875_v43 = vpop.permute.xlu0 %874 }
 0x271   : > { %v958_v51 = vcombine.low %v775_v25, %v881_v42  ;;  %v959_v52 = vcombine.high %v775_v25, %v881_v42 }
 0x273   : > { %v966_v62 = vrot.slane %v958_v51, %v4120_v50  ;;  %v973_v63 = vrot.slane %v959_v52, %v4120_v50 }
 0x274   : > { %v879_v48 = vpop.permute.xlu1 %878  ;;  %v873_v49 = vpop.permute.xlu0 %872 }
 0x275   : > { %v890_v54 = vcombine.low %v770_v27, %v879_v48  ;;  %v891_v55 = vcombine.high %v770_v27, %v879_v48 }
 0x277   : > { %v898_v5 = vrot.slane %v890_v54, %v4120_v50  ;;  %v905_v6 = vrot.slane %v891_v55, %v4120_v50 }
 0x278   : > { %v887_v56 = vpop.permute.xlu1 %886  ;;  %v885_v57 = vpop.permute.xlu0 %884 }
 0x279   : > { %v974_v58 = vcombine.low %v875_v43, %v887_v56  ;;  %v975_v59 = vcombine.high %v875_v43, %v887_v56  ;;  %v906_v60 = vcombine.low %v873_v49, %v885_v57  ;;  %v907_v61 = vcombine.high %v873_v49, %v885_v57 }
 0x27b   : > { %v982_v1 = vrot.slane %v974_v58, %v4120_v50  ;;  %v989_v2 = vrot.slane %v975_v59, %v4120_v50  ;;  %v914_v3 = vrot.slane %v906_v60, %v4120_v50  ;;  %v921_v4 = vrot.slane %v907_v61, %v4120_v50 }
 0x27c   : > { %v1562_v35 = vpop.permute.xlu0 %1561  ;;  %v1565_v61 = vpop.permute.xlu1 %1564 }
 0x27d   : > { %v990_v7 = vcombine.low %v966_v62, %v982_v1  ;;  %v991_v8 = vcombine.high %v966_v62, %v982_v1  ;;  %v1006_v9 = vcombine.low %v973_v63, %v989_v2  ;;  %v1007_v10 = vcombine.high %v973_v63, %v989_v2 }
 0x27e   : > { %v922_v11 = vcombine.low %v898_v5, %v914_v3  ;;  %v923_v12 = vcombine.high %v898_v5, %v914_v3  ;;  %v938_v13 = vcombine.low %v905_v6, %v921_v4  ;;  %v939_v14 = vcombine.high %v905_v6, %v921_v4 }
 0x27f   : > { %v998_v16 = vrot.slane %v990_v7, %v4124_v0  ;;  %v1005_v17 = vrot.slane %v991_v8, %v4124_v0  ;;  %v1014_v18 = vrot.slane %v1006_v9, %v4124_v0  ;;  %v1021_v21 = vrot.slane %v1007_v10, %v4124_v0 }
 0x280   : > { %v930_v22 = vrot.slane %v922_v11, %v4124_v0  ;;  %v937_v23 = vrot.slane %v923_v12, %v4124_v0  ;;  %v946_v24 = vrot.slane %v938_v13, %v4124_v0  ;;  %v953_v25 = vrot.slane %v939_v14, %v4124_v0  ;;  %v1568_v62 = vpop.permute.xlu0 %1567 }
 0x281   : > { %v1094_v26 = vcombine.low %v998_v16, %v1005_v17  ;;  %v2881_v27 = vcombine.high %v998_v16, %v1005_v17  ;;  %v1110_v28 = vcombine.low %v1014_v18, %v1021_v21  ;;  %v2882_v29 = vcombine.high %v1014_v18, %v1021_v21 }
 0x282   : > { %v1026_v30 = vcombine.low %v930_v22, %v937_v23  ;;  %v2879_v31 = vcombine.high %v930_v22, %v937_v23  ;;  %v1042_v33 = vcombine.low %v946_v24, %v953_v25  ;;  %v2880_v34 = vcombine.high %v946_v24, %v953_v25 }
 0x283   : > { %v1101_v36 = vrot.slane %v1094_v26, %v4120_v50  ;;  %v1109_v37 = vrot.slane %v2881_v27, %v4120_v50  ;;  %v1117_v38 = vrot.slane %v1110_v28, %v4120_v50  ;;  %v1125_v39 = vrot.slane %v2882_v29, %v4120_v50 }
 0x284   : > { %v1033_v40 = vrot.slane %v1026_v30, %v4120_v50  ;;  %v1041_v41 = vrot.slane %v2879_v31, %v4120_v50  ;;  %v1049_v42 = vrot.slane %v1042_v33, %v4120_v50  ;;  %v1057_v43 = vrot.slane %v2880_v34, %v4120_v50 }
 0x285   : > { %v1126_v44 = vcombine.low %v1101_v36, %v1109_v37  ;;  %v1127_v45 = vcombine.high %v1101_v36, %v1109_v37  ;;  %v1142_v46 = vcombine.low %v1117_v38, %v1125_v39  ;;  %v1143_v47 = vcombine.high %v1117_v38, %v1125_v39 }
 0x286   : > { %v1058_v48 = vcombine.low %v1033_v40, %v1041_v41  ;;  %v1059_v49 = vcombine.high %v1033_v40, %v1041_v41  ;;  %v1074_v51 = vcombine.low %v1049_v42, %v1057_v43  ;;  %v1075_v52 = vcombine.high %v1049_v42, %v1057_v43 }
 0x287   : > { %v1134_v53 = vrot.slane %v1126_v44, %v4124_v0  ;;  %v1141_v54 = vrot.slane %v1127_v45, %v4124_v0  ;;  %v1150_v55 = vrot.slane %v1142_v46, %v4124_v0  ;;  %v1157_v56 = vrot.slane %v1143_v47, %v4124_v0 }
 0x288   : > { %v1066_v57 = vrot.slane %v1058_v48, %v4124_v0  ;;  %v1073_v58 = vrot.slane %v1059_v49, %v4124_v0  ;;  %v1082_v59 = vrot.slane %v1074_v51, %v4124_v0  ;;  %v1089_v60 = vrot.slane %v1075_v52, %v4124_v0 }
 0x289   : > { %v1158_v63 = vcombine.low %v1134_v53, %v1150_v55  ;;  %v1159_v1 = vcombine.high %v1134_v53, %v1150_v55  ;;  %v1160_v2 = vcombine.low %v1141_v54, %v1157_v56  ;;  %v1161_v3 = vcombine.high %v1141_v54, %v1157_v56 }
 0x28a   : > { %v1090_v4 = vcombine.low %v1066_v57, %v1082_v59  ;;  %v1091_v5 = vcombine.high %v1066_v57, %v1082_v59  ;;  %v1092_v6 = vcombine.low %v1073_v58, %v1089_v60  ;;  %v1093_v7 = vcombine.high %v1073_v58, %v1089_v60 }
 0x28b   : > { %1164 = vst.msk [vmem:[#allocation2 + $0x8] sm:$0xff] %vm1162_vm2, %v1158_v63  ;;  %1166 = vst.msk [vmem:[#allocation2 + $0x18] sm:$0xff] %vm1162_vm2, %v1159_v1  ;;  %v1570_v8 = vcombine.low %v4106_v32, %v1565_v61  ;;  %v1571_v9 = vcombine.high %v4106_v32, %v1565_v61  ;;  %v1586_v10 = vcombine.low %v1562_v35, %v1568_v62  ;;  %v2986_v61 = vpop.f32.mrb[0].mxu1 }
 0x28c   : > { %1168 = vst.msk [vmem:[#allocation2 + $0x28] sm:$0xff] %vm1162_vm2, %v1160_v2  ;;  %1170 = vst.msk [vmem:[#allocation2 + $0x38] sm:$0xff] %vm1162_vm2, %v1161_v3  ;;  %v1587_v11 = vcombine.high %v1562_v35, %v1568_v62  ;;  %v861_v62 = vpop.f32.mrb[1].mxu1 }
 0x28d   : > { %1163 = vst.msk [vmem:[#allocation2] sm:$0xff] %vm1162_vm2, %v1090_v4  ;;  %1165 = vst.msk [vmem:[#allocation2 + $0x10] sm:$0xff] %vm1162_vm2, %v1091_v5  ;;  %v1578_v12 = vrot.slane %v1570_v8, %v4120_v50  ;;  %v1585_v13 = vrot.slane %v1571_v9, %v4120_v50  ;;  %v1594_v14 = vrot.slane %v1586_v10, %v4120_v50 }
 0x28e   : > { %1167 = vst.msk [vmem:[#allocation2 + $0x20] sm:$0xff] %vm1162_vm2, %v1092_v6  ;;  %1169 = vst.msk [vmem:[#allocation2 + $0x30] sm:$0xff] %vm1162_vm2, %v1093_v7  ;;  %v1601_v16 = vrot.slane %v1587_v11, %v4120_v50 }
 0x28f   : > { %v1602_v17 = vcombine.low %v1578_v12, %v1594_v14  ;;  %v1603_v32 = vcombine.high %v1578_v12, %v1594_v14  ;;  %v2876_v12 = vld [vmem:[%s4488_s13] ss:$0 sm:$0xff] }
 0x290   : > { %v1618_v18 = vcombine.low %v1585_v13, %v1601_v16  ;;  %v1619_v21 = vcombine.high %v1585_v13, %v1601_v16  ;;  %v867_v13 = vadd.f32 %v2986_v61, %v2876_v12  ;;  %v862_v14 = vadd.f32 %v2876_v12, %v861_v62 }
 0x291   : > { %v1610_v22 = vrot.slane %v1602_v17, %v4124_v0  ;;  %v1617_v23 = vrot.slane %v1603_v32, %v4124_v0 }
 0x292   : > { %v1626_v24 = vrot.slane %v1618_v18, %v4124_v0  ;;  %v1633_v25 = vrot.slane %v1619_v21, %v4124_v0  ;;  %v1707_v26 = vld [vmem:[#allocation2 + $0x8] sm:$0xff]  ;;  %v1709_v27 = vld [vmem:[#allocation2 + $0x18] sm:$0xff] }
 0x293   : > { %v1638_v28 = vcombine.low %v1610_v22, %v1617_v23  ;;  %v2889_v29 = vcombine.high %v1610_v22, %v1617_v23  ;;  %v1711_v44 = vld [vmem:[#allocation2 + $0x28] sm:$0xff]  ;;  %v1713_v49 = vld [vmem:[#allocation2 + $0x38] sm:$0xff] }
 0x294   : > { %v1654_v30 = vcombine.low %v1626_v24, %v1633_v25  ;;  %v2890_v31 = vcombine.high %v1626_v24, %v1633_v25  ;;  %v1706_v33 = vld [vmem:[#allocation2] sm:$0xff]  ;;  %v1708_v35 = vld [vmem:[#allocation2 + $0x10] sm:$0xff] }
 0x295   : > { %v3088_v36 = vpack.c.bf16 %v1707_v26, %v1706_v33  ;;  %v3092_v37 = vpack.c.bf16 %v1709_v27, %v1708_v35  ;;  %v1645_v38 = vrot.slane %v1638_v28, %v4120_v50  ;;  %v1653_v39 = vrot.slane %v2889_v29, %v4120_v50  ;;  %v1710_v47 = vld [vmem:[#allocation2 + $0x20] sm:$0xff]  ;;  %v1712_v48 = vld [vmem:[#allocation2 + $0x30] sm:$0xff] }
 0x296   : > { %v1661_v40 = vrot.slane %v1654_v30, %v4120_v50  ;;  %v1669_v41 = vrot.slane %v2890_v31, %v4120_v50  ;;  %v3096_v55 = vpack.c.bf16 %v1711_v44, %v1710_v47  ;;  %v3100_v56 = vpack.c.bf16 %v1713_v49, %v1712_v48 }
 0x297   : > { %3090 = vmatpush3.bf16.xpose.msk.msra.mxu1 %vm4176_vm3, %v3088_v36  ;;  %3094 = vmatpush3.bf16.xpose.msk.msra.mxu0 %vm4176_vm3, %v3092_v37  ;;  %v1670_v42 = vcombine.low %v1645_v38, %v1653_v39  ;;  %v1671_v51 = vcombine.high %v1645_v38, %v1653_v39 }
 0x298   : > { %v1686_v43 = vcombine.low %v1661_v40, %v1669_v41  ;;  %3095 = vmatprep.subr.bf16.mxu1 %v3616_v15  ;;  %3099 = vmatprep.subr.bf16.mxu0 %v3616_v15  ;;  %v1687_v52 = vcombine.high %v1661_v40, %v1669_v41 }
 0x299   : > { %v1678_v45 = vrot.slane %v1670_v42, %v4124_v0  ;;  %v1685_v57 = vrot.slane %v1671_v51, %v4124_v0 }
 0x29a   : > { %v1694_v46 = vrot.slane %v1686_v43, %v4124_v0  ;;  %v1701_v58 = vrot.slane %v1687_v52, %v4124_v0 }
 0x29c   : > { %v1702_v53 = vcombine.low %v1678_v45, %v1694_v46  ;;  %v1703_v54 = vcombine.high %v1678_v45, %v1694_v46  ;;  %v1704_v59 = vcombine.low %v1685_v57, %v1701_v58  ;;  %v1705_v60 = vcombine.high %v1685_v57, %v1701_v58 }
 0x29e   : > { %3003 = vmatmul.mubr.msk.f32.vlgmr.msra.gmra.mrb[2].mxu1 %vm1162_vm2, %v1702_v53  ;;  %3010 = vmatmul.mubr.msk.f32.vlgmr.msra.gmra.mrb[4].mxu0 %vm1162_vm2, %v1703_v54 }
 0x29f   : > { %3098 = vmatpush3.bf16.xpose.msk.msra.mxu1 %vm4176_vm3, %v3096_v55  ;;  %3102 = vmatpush3.bf16.xpose.msk.msra.mxu0 %vm4176_vm3, %v3100_v56 }
 0x2a0   : > { %3016 = vmatprep.mubr.msk.f32.mxu1 %vm3617_vm1, %v3618_v19  ;;  %3023 = vmatprep.mubr.msk.f32.mxu0 %vm3617_vm1, %v3618_v19 }
 0x2a1   : > { %3103 = vmatprep.subr.bf16.mxu1 %v3616_v15  ;;  %3115 = vmatprep.subr.bf16.mxu0 %v3616_v15 }
 0x2a6   : > { %3017 = vmatmul.mubr.msk.f32.vlgmr.msra.gmra.mrb[4].mxu1 %vm1162_vm2, %v1704_v59  ;;  %3024 = vmatmul.mubr.msk.f32.vlgmr.msra.gmra.mrb[6].mxu0 %vm1162_vm2, %v1705_v60 }
 0x2a7   : > { %3030 = vmatprep.mubr.msk.f32.mxu1 %vm3617_vm1, %v3618_v19  ;;  %3062 = vmatprep.mubr.msk.f32.mxu0 %vm3617_vm1, %v3618_v19 }
 0x371   : > { %v1790_v63 = vpop.f32.mrb[2].mxu1  ;;  %v1869_v1 = vpop.f32.mrb[4].mxu0 }
 0x372   : > { %v3004_v2 = vpop.f32.mrb[3].mxu1  ;;  %v3011_v3 = vpop.f32.mrb[5].mxu0  ;;  %v2035_v4 = vsel %vm2031_vm4, %v1869_v1, -inf  ;;  %v2032_v5 = vsel %vm2031_vm4, %v1790_v63, -inf }
 0x373   : > { %2036 = vmax.xlane.f32.xlu0 %v2035_v4  ;;  %2033 = vmax.xlane.f32.xlu1 %v2032_v5 }
 0x379   : > { %v1948_v6 = vpop.f32.mrb[4].mxu1  ;;  %v2027_v7 = vpop.f32.mrb[6].mxu0 }
 0x37a   : > { %v3018_v8 = vpop.f32.mrb[5].mxu1  ;;  %v3025_v9 = vpop.f32.mrb[7].mxu0  ;;  %v2041_v10 = vsel %vm2031_vm4, %v2027_v7, -inf  ;;  %v2038_v11 = vsel %vm2031_vm4, %v1948_v6, -inf }
 0x37b   : > { %2042 = vmax.xlane.f32.xlu1 %v2041_v10  ;;  %2039 = vmax.xlane.f32.xlu0 %v2038_v11 }
 0x38c   : > { %1175 = vrot.lane.b32.xlu1 %v867_v13, %s3620_s14 }
 0x390   : > { %1179 = vrot.lane.b32.xlu1 %v862_v14, %s3619_s10 }
 0x391   : > { %1173 = vrot.lane.b32.xlu0 %v862_v14, %s3620_s14  ;;  %s2914_s14 = sshll.u32 %s4490_s27, 7 }
 0x392   : > { %s4335_s13 = scalar_lea.hbm %s4494_s30, %s2914_s14 }
 0x394   : > { %1185 = vrot.lane.b32.xlu1 %v862_v14, %s3621_s29 }
 0x395   : > { %1181 = vrot.lane.b32.xlu0 %v867_v13, %s3619_s10  ;;  %s4493_s10 = sld [smem:[#allocation44_spill]] }
 0x399   : > { %1187 = vrot.lane.b32.xlu0 %v867_v13, %s3621_s29 }
 0x400   : > { %v2037_v16 = vpop.xlane.xlu0 %2036  ;;  %v2034_v17 = vpop.xlane.xlu1 %2033 }
 0x401   : > { %v2045_v32 = vsub.f32 %v1869_v1, %v2037_v16  ;;  %v2044_v18 = vsub.f32 %v1790_v63, %v2034_v17 }
 0x403   : > { %v2050_v21 = vmul.f32 1.442695, %v2045_v32  ;;  %v2048_v22 = vmul.f32 1.442695, %v2044_v18 }
 0x405   : > { %3252 = vpow2.f32 %v2050_v21 }
 0x406   : > { %3254 = vpow2.f32 %v2048_v22 }
 0x408   : > { %v2043_v23 = vpop.xlane.xlu1 %2042  ;;  %v2040_v24 = vpop.xlane.xlu0 %2039 }
 0x409   : > { %v2047_v25 = vsub.f32 %v2027_v7, %v2043_v23  ;;  %v2046_v31 = vsub.f32 %v1948_v6, %v2040_v24 }
 0x40b   : > { %v2054_v26 = vmul.f32 1.442695, %v2047_v25  ;;  %v2052_v39 = vmul.f32 1.442695, %v2046_v31 }
 0x40c   : > { %v1176_v27 = vpop.permute.xlu1 %1175  ;;  %v1174_v28 = vpop.permute.xlu0 %1173 }
 0x40d   : > { %3256 = vpow2.f32 %v2054_v26 }
 0x40e   : > { %3258 = vpow2.f32 %v2052_v39 }
 0x40f   : > { %v4225_v29 = vpop.eup %3252 }
 0x410   : > { %v4227_v30 = vpop.eup %3254  ;;  %v1180_v33 = vpop.permute.xlu1 %1179  ;;  %v2059_v35 = vsel %vm2031_vm4, %v4225_v29, 0.0 }
 0x411   : > { %v1182_v34 = vpop.permute.xlu0 %1181  ;;  %2060 = vadd.xlane.f32.xlu0 %v2059_v35  ;;  %v1191_v36 = vcombine.low %v862_v14, %v1180_v33  ;;  %v1192_v37 = vcombine.high %v862_v14, %v1180_v33  ;;  %v2056_v38 = vsel %vm2031_vm4, %v4227_v30, 0.0 }
 0x412   : > { %2057 = vadd.xlane.f32.xlu1 %v2056_v38  ;;  %v1259_v40 = vcombine.low %v867_v13, %v1182_v34  ;;  %v1260_v41 = vcombine.high %v867_v13, %v1182_v34 }
 0x413   : > { %v1199_v48 = vrot.slane %v1191_v36, %v4120_v50  ;;  %v1206_v49 = vrot.slane %v1192_v37, %v4120_v50 }
 0x414   : > { %v1186_v42 = vpop.permute.xlu1 %1185  ;;  %v1267_v56 = vrot.slane %v1259_v40, %v4120_v50  ;;  %v1274_v57 = vrot.slane %v1260_v41, %v4120_v50 }
 0x415   : > { %v1188_v43 = vpop.permute.xlu0 %1187  ;;  %v1207_v44 = vcombine.low %v1174_v28, %v1186_v42  ;;  %v1208_v45 = vcombine.high %v1174_v28, %v1186_v42 }
 0x416   : > { %v1275_v46 = vcombine.low %v1176_v27, %v1188_v43  ;;  %v1276_v47 = vcombine.high %v1176_v27, %v1188_v43 }
 0x417   : > { %v4235_v51 = vpop.eup %3256  ;;  %v1215_v52 = vrot.slane %v1207_v44, %v4120_v50  ;;  %v1222_v53 = vrot.slane %v1208_v45, %v4120_v50 }
 0x418   : > { %v1283_v54 = vrot.slane %v1275_v46, %v4120_v50  ;;  %v1290_v55 = vrot.slane %v1276_v47, %v4120_v50  ;;  %v2065_v58 = vsel %vm2031_vm4, %v4235_v51, 0.0  ;;  %v4261_v37 = vpop.eup %3258 }
 0x419   : > { %v1223_v59 = vcombine.low %v1199_v48, %v1215_v52  ;;  %v1224_v60 = vcombine.high %v1199_v48, %v1215_v52  ;;  %v1239_v61 = vcombine.low %v1206_v49, %v1222_v53  ;;  %v1240_v62 = vcombine.high %v1206_v49, %v1222_v53  ;;  %2066 = vadd.xlane.f32.xlu1 %v2065_v58 }
 0x41a   : > { %v1291_v63 = vcombine.low %v1267_v56, %v1283_v54  ;;  %v1292_v1 = vcombine.high %v1267_v56, %v1283_v54  ;;  %v1307_v2 = vcombine.low %v1274_v57, %v1290_v55  ;;  %v1308_v3 = vcombine.high %v1274_v57, %v1290_v55 }
 0x41b   : > { %v1231_v4 = vrot.slane %v1223_v59, %v4124_v0  ;;  %v1238_v5 = vrot.slane %v1224_v60, %v4124_v0  ;;  %v1247_v6 = vrot.slane %v1239_v61, %v4124_v0  ;;  %v1254_v7 = vrot.slane %v1240_v62, %v4124_v0 }
 0x41c   : > { %v1299_v8 = vrot.slane %v1291_v63, %v4124_v0  ;;  %v1306_v9 = vrot.slane %v1292_v1, %v4124_v0  ;;  %v1315_v10 = vrot.slane %v1307_v2, %v4124_v0  ;;  %v1322_v11 = vrot.slane %v1308_v3, %v4124_v0 }
 0x41d   : > { %v1327_v12 = vcombine.low %v1231_v4, %v1238_v5  ;;  %v2883_v13 = vcombine.high %v1231_v4, %v1238_v5  ;;  %v1343_v14 = vcombine.low %v1247_v6, %v1254_v7  ;;  %v2884_v16 = vcombine.high %v1247_v6, %v1254_v7 }
 0x41e   : > { %v1395_v17 = vcombine.low %v1299_v8, %v1306_v9  ;;  %v2885_v32 = vcombine.high %v1299_v8, %v1306_v9  ;;  %v1411_v18 = vcombine.low %v1315_v10, %v1322_v11  ;;  %v2886_v21 = vcombine.high %v1315_v10, %v1322_v11 }
 0x41f   : > { %v1334_v22 = vrot.slane %v1327_v12, %v4120_v50  ;;  %v1342_v23 = vrot.slane %v2883_v13, %v4120_v50  ;;  %v1350_v24 = vrot.slane %v1343_v14, %v4120_v50  ;;  %v1358_v25 = vrot.slane %v2884_v16, %v4120_v50 }
 0x420   : > { %v1402_v26 = vrot.slane %v1395_v17, %v4120_v50  ;;  %v1410_v27 = vrot.slane %v2885_v32, %v4120_v50  ;;  %v1418_v28 = vrot.slane %v1411_v18, %v4120_v50  ;;  %v1426_v31 = vrot.slane %v2886_v21, %v4120_v50 }
 0x421   : > { %v1359_v33 = vcombine.low %v1334_v22, %v1342_v23  ;;  %v1360_v34 = vcombine.high %v1334_v22, %v1342_v23  ;;  %v1375_v35 = vcombine.low %v1350_v24, %v1358_v25  ;;  %v1376_v36 = vcombine.high %v1350_v24, %v1358_v25  ;;  %v2528_v22 = vld [vmem:[#allocation16] sm:$0xff]  ;;  %v2529_v23 = vld [vmem:[#allocation16 + $0x8] sm:$0xff] }
 0x422   : > { %v1427_v38 = vcombine.low %v1402_v26, %v1410_v27  ;;  %v1428_v39 = vcombine.high %v1402_v26, %v1410_v27  ;;  %v1443_v40 = vcombine.low %v1418_v28, %v1426_v31  ;;  %v1444_v41 = vcombine.high %v1418_v28, %v1426_v31 }
 0x423   : > { %v1367_v42 = vrot.slane %v1359_v33, %v4124_v0  ;;  %v1374_v43 = vrot.slane %v1360_v34, %v4124_v0  ;;  %v1383_v44 = vrot.slane %v1375_v35, %v4124_v0  ;;  %v1390_v45 = vrot.slane %v1376_v36, %v4124_v0 }
 0x424   : > { %v1435_v46 = vrot.slane %v1427_v38, %v4124_v0  ;;  %v1442_v47 = vrot.slane %v1428_v39, %v4124_v0  ;;  %v1451_v48 = vrot.slane %v1443_v40, %v4124_v0  ;;  %v1458_v49 = vrot.slane %v1444_v41, %v4124_v0 }
 0x425   : > { %v1391_v52 = vcombine.low %v1367_v42, %v1383_v44  ;;  %v1392_v53 = vcombine.high %v1367_v42, %v1383_v44  ;;  %v1393_v54 = vcombine.low %v1374_v43, %v1390_v45  ;;  %v1394_v55 = vcombine.high %v1374_v43, %v1390_v45  ;;  %v2530_v45 = vld [vmem:[#allocation16 + $0x10] sm:$0xff] }
 0x426   : > { %v1459_v56 = vcombine.low %v1435_v46, %v1451_v48  ;;  %v1460_v57 = vcombine.high %v1435_v46, %v1451_v48  ;;  %v1461_v58 = vcombine.low %v1442_v47, %v1458_v49  ;;  %v1462_v59 = vcombine.high %v1442_v47, %v1458_v49  ;;  %v2531_v46 = vld [vmem:[#allocation16 + $0x18] sm:$0xff] }
 0x427   : > { %1463 = vst.msk [vmem:[#allocation3] sm:$0xff] %vm1162_vm2, %v1391_v52  ;;  %1465 = vst.msk [vmem:[#allocation3 + $0x10] sm:$0xff] %vm1162_vm2, %v1392_v53  ;;  %v2062_v60 = vsel %vm2031_vm4, %v4261_v37, 0.0  ;;  %v3116_v24 = vpack.c.bf16 %v2529_v23, %v2528_v22  ;;  %v3119_v53 = vpack.c.bf16 %v2531_v46, %v2530_v45 }
 0x428   : > { %1467 = vst.msk [vmem:[#allocation3 + $0x20] sm:$0xff] %vm1162_vm2, %v1393_v54  ;;  %1469 = vst.msk [vmem:[#allocation3 + $0x30] sm:$0xff] %vm1162_vm2, %v1394_v55  ;;  %2063 = vadd.xlane.f32.xlu0 %v2062_v60 }
 0x429   : > { %1464 = vst.msk [vmem:[#allocation3 + $0x8] sm:$0xff] %vm1162_vm2, %v1459_v56  ;;  %1466 = vst.msk [vmem:[#allocation3 + $0x18] sm:$0xff] %vm1162_vm2, %v1460_v57  ;;  %3117 = vmatpush3.bf16.msra.mxu0 %v3116_v24 }
 0x42a   : > { %1468 = vst.msk [vmem:[#allocation3 + $0x28] sm:$0xff] %vm1162_vm2, %v1461_v58  ;;  %1470 = vst.msk [vmem:[#allocation3 + $0x38] sm:$0xff] %vm1162_vm2, %v1462_v59  ;;  %3118 = vmatprep.subr.bf16.mxu0 %v3616_v15 }
 0x42d   : > { %3120 = vmatpush3.bf16.msra.mxu0 %v3119_v53 }
 0x42e   : > { %v2076_v61 = vld [vmem:[#allocation3] sm:$0xff]  ;;  %v2078_v3 = vld [vmem:[#allocation3 + $0x10] sm:$0xff] }
 0x42f   : > { %v2080_v9 = vld [vmem:[#allocation3 + $0x20] sm:$0xff]  ;;  %v2082_v14 = vld [vmem:[#allocation3 + $0x30] sm:$0xff] }
 0x430   : > { %v2077_v62 = vld [vmem:[#allocation3 + $0x8] sm:$0xff]  ;;  %v2079_v4 = vld [vmem:[#allocation3 + $0x18] sm:$0xff] }
 0x431   : > { %v3104_v63 = vpack.c.bf16 %v2077_v62, %v2076_v61  ;;  %v3107_v8 = vpack.c.bf16 %v2079_v4, %v2078_v3  ;;  %v2081_v10 = vld [vmem:[#allocation3 + $0x28] sm:$0xff]  ;;  %v2083_v16 = vld [vmem:[#allocation3 + $0x38] sm:$0xff] }
 0x432   : > { %v3110_v12 = vpack.c.bf16 %v2081_v10, %v2080_v9  ;;  %v3113_v18 = vpack.c.bf16 %v2083_v16, %v2082_v14  ;;  %v2910_v16 = vld [vmem:[%s4489_s16] ss:$0 sm:$0xff] }
 0x433   : > { %3105 = vmatpush3.bf16.msra.mxu1 %v3104_v63 }
 0x434   : > { %3106 = vmatprep.subr.bf16.mxu1 %v3616_v15 }
 0x49e   : > { %v2061_v2 = vpop.xlane.xlu0 %2060 }
 0x49f   : > { %v2058_v1 = vpop.xlane.xlu1 %2057 }
 0x4a0   : > { %3260 = vrcp.f32 %v2058_v1 }
 0x4a1   : > { %3262 = vrcp.f32 %v2061_v2 }
 0x4aa   : > { %v3261_v5 = vpop.eup %3260 }
 0x4ab   : > { %v2069_v6 = vmul.f32 %v3261_v5, %v4227_v30  ;;  %v3263_v7 = vpop.eup %3262  ;;  %v2067_v30 = vpop.xlane.xlu1 %2066 }
 0x4ac   : > { %v2071_v11 = vmul.f32 %v3263_v7, %v4225_v29 }
 0x4ad   : > { %3031 = vmatmul.mubr.msk.f32.vlgmr.msra.gmra.mrb[6].mxu1 %vm2031_vm4, %v2069_v6 }
 0x4ae   : > { %3108 = vmatpush3.bf16.msra.mxu1 %v3107_v8  ;;  %3037 = vmatprep.mubr.msk.f32.mxu1 %vm3617_vm1, %v3618_v19 }
 0x4af   : > { %3109 = vmatprep.subr.bf16.mxu1 %v3616_v15 }
 0x4b1   : > { %3038 = vmatmul.mubr.msk.f32.vlgmr.msra.gmra.mrb[8].mxu1 %vm2031_vm4, %v2071_v11 }
 0x4b2   : > { %3111 = vmatpush3.bf16.msra.mxu1 %v3110_v12  ;;  %3044 = vmatprep.mubr.msk.f32.mxu1 %vm3617_vm1, %v3618_v19 }
 0x4b3   : > { %3112 = vmatprep.subr.bf16.mxu1 %v3616_v15 }
 0x4b5   : > { %v2064_v13 = vpop.xlane.xlu0 %2063 }
 0x4b6   : > { %3264 = vrcp.f32 %v2064_v13 }
 0x4b7   : > { %3266 = vrcp.f32 %v2067_v30 }
 0x4c0   : > { %v3265_v17 = vpop.eup %3264 }
 0x4c1   : > { %v2073_v29 = vmul.f32 %v3265_v17, %v4261_v37  ;;  %v3267_v32 = vpop.eup %3266 }
 0x4c2   : > { %v2075_v21 = vmul.f32 %v3267_v32, %v4235_v51 }
 0x4c3   : > { %3045 = vmatmul.mubr.msk.f32.vlgmr.msra.gmra.mrb[10].mxu1 %vm2031_vm4, %v2073_v29 }
 0x4c4   : > { %3114 = vmatpush3.bf16.msra.mxu1 %v3113_v18  ;;  %3051 = vmatprep.mubr.msk.f32.mxu1 %vm3617_vm1, %v3618_v19 }
 0x4c7   : > { %3052 = vmatmul.mubr.msk.f32.vlgmr.msra.gmra.mrb[12].mxu1 %vm2031_vm4, %v2075_v21 }
 0x580   : > { %v2153_v25 = vpop.f32.mrb[6].mxu1 }
 0x581   : > { %v3032_v26 = vpop.f32.mrb[7].mxu1 }
 0x584   : > { %v2226_v27 = vpop.f32.mrb[8].mxu1 }
 0x585   : > { %v3039_v28 = vpop.f32.mrb[9].mxu1 }
 0x596   : > { %v2299_v31 = vpop.f32.mrb[10].mxu1 }
 0x597   : > { %v2376_v33 = vcombine.low %v2153_v25, %v2299_v31  ;;  %v2377_v34 = vcombine.high %v2153_v25, %v2299_v31  ;;  %v3046_v35 = vpop.f32.mrb[11].mxu1  ;;  %v2911_v31 = vld [vmem:[%s4492_s19] ss:$0 sm:$0xff] }
 0x599   : > { %v2384_v38 = vrot.slane %v2376_v33, %v4120_v50  ;;  %v2391_v39 = vrot.slane %v2377_v34, %v4120_v50  ;;  %v2912_v34 = vld [vmem:[%s4493_s10] ss:$0 sm:$0xff] }
 0x59a   : > { %v2372_v36 = vpop.f32.mrb[12].mxu1 }
 0x59b   : > { %v2392_v19 = vcombine.low %v2226_v27, %v2372_v36  ;;  %v2393_v37 = vcombine.high %v2226_v27, %v2372_v36  ;;  %v3053_v51 = vpop.f32.mrb[13].mxu1 }
 0x59d   : > { %v2400_v40 = vrot.slane %v2392_v19, %v4120_v50  ;;  %v2407_v15 = vrot.slane %v2393_v37, %v4120_v50 }
 0x59f   : > { %v2408_v41 = vcombine.low %v2384_v38, %v2400_v40  ;;  %v2409_v42 = vcombine.high %v2384_v38, %v2400_v40  ;;  %v2424_v43 = vcombine.low %v2391_v39, %v2407_v15  ;;  %v2425_v44 = vcombine.high %v2391_v39, %v2407_v15 }
 0x5a1   : > { %v2416_v47 = vrot.slane %v2408_v41, %v4124_v0  ;;  %v2423_v48 = vrot.slane %v2409_v42, %v4124_v0  ;;  %v2432_v49 = vrot.slane %v2424_v43, %v4124_v0  ;;  %v2439_v52 = vrot.slane %v2425_v44, %v4124_v0 }
 0x5a3   : > { %v2444_v54 = vcombine.low %v2416_v47, %v2423_v48  ;;  %v2907_v55 = vcombine.high %v2416_v47, %v2423_v48  ;;  %v2460_v56 = vcombine.low %v2432_v49, %v2439_v52  ;;  %v2908_v57 = vcombine.high %v2432_v49, %v2439_v52 }
 0x5a5   : > { %v2451_v58 = vrot.slane %v2444_v54, %v4120_v50  ;;  %v2459_v59 = vrot.slane %v2907_v55, %v4120_v50  ;;  %v2467_v60 = vrot.slane %v2460_v56, %v4120_v50  ;;  %v2475_v61 = vrot.slane %v2908_v57, %v4120_v50 }
 0x5a7   : > { %v2477_v62 = vcombine.high %v2451_v58, %v2459_v59  ;;  %v2493_v63 = vcombine.high %v2467_v60, %v2475_v61  ;;  %v2476_v1 = vcombine.low %v2451_v58, %v2459_v59  ;;  %v2492_v2 = vcombine.low %v2467_v60, %v2475_v61 }
 0x5a9   : > { %v2491_v3 = vrot.slane %v2477_v62, %v4124_v0  ;;  %v2507_v4 = vrot.slane %v2493_v63, %v4124_v0  ;;  %v2484_v5 = vrot.slane %v2476_v1, %v4124_v0  ;;  %v2500_v6 = vrot.slane %v2492_v2, %v4124_v0 }
 0x5ab   : > { %v2510_v7 = vcombine.low %v2491_v3, %v2507_v4  ;;  %v2509_v8 = vcombine.high %v2484_v5, %v2500_v6  ;;  %v2511_v9 = vcombine.high %v2491_v3, %v2507_v4  ;;  %v2508_v10 = vcombine.low %v2484_v5, %v2500_v6 }
 0x5ad   : > { %2517 = vrot.lane.b32.xlu1 %v2510_v7, %s3624_s24  ;;  %2513 = vrot.lane.b32.xlu0 %v2509_v8, %s3625_s15  ;;  %s2646_s24 = scalar_lea.sflag [#allocation6], %s4044_s20  ;;  %s3502_s15 = scalar_lea.vmem %s4337_s5, 128 }
 0x5ae   : > { %p3503_p12 = scmp.ne.s32.totalorder %s4337_s5, %s3502_s15 }
 0x5b0   : > { %p3504_p3 = pnand %p3503_p12, %p4496_p0 }
 0x5b1   : > { %2521 = vrot.lane.b32.xlu1 %v2511_v9, %s3626_s25  ;;  %s3506_s25 = sshll.u32 %s3627_s21, 4  ;;  %s3507_s25 = int_to_ptr.vmem [resolvable:$false] %s3506_s25 }
 0x5b2   : > { %p3505_p2 = pneg %p3504_p3  ;;  %s3508_s23 = scalar_lea.vmem %s3507_s25, 256 }
 0x5b3   : > { %p3509_p10 = scmp.lt.s32.totalorder %s4337_s5, %s3507_s25  ;;  %p3510_p5 = scmp.lt.s32.totalorder %s3508_s23, %s3502_s15 }
 0x5b5   : > { %p3511_p8 = por %p3510_p5, %p3509_p10 }
 0x5b7   : > { %p3512_p13 = pnand %p3511_p8, %p3505_p2 }
 0x61f   : > { %v2518_v50 = vpop.permute.xlu1 %2517  ;;  %v2514_v11 = vpop.permute.xlu0 %2513 }
 0x620   : > { %v2524_v12 = vsel %vm1162_vm2, %v2508_v10, %v2514_v11 }
 0x621   : > { %v2525_v13 = vsel %vm2031_vm4, %v2524_v12, %v2518_v50 }
 0x623   : > { %v2522_v30 = vpop.permute.xlu1 %2521 }
 0x624   : > { %v2527_v14 = vsel %vm2526_vm5, %v2525_v13, %v2522_v30 }
 0x625   : > { %3063 = vmatmul.mubr.msk.f32.vlgmr.msra.gmra.mrb[8].mxu0 %vm696_vm0, %v2527_v14 }
 0x6f8   : > { %v2601_v0 = vpop.f32.mrb[8].mxu0 }
 0x6f9   : > { %v2605_v17 = vadd.f32 %v2601_v0, %v4086_v20  ;;  %v3064_v29 = vpop.f32.mrb[9].mxu0 }
 0x6fb   : > { %v2613_v32 = vadd.f32 %v2910_v16, %v2605_v17 }
 0x6fd   : > { %v2614_v18 = vsel %vm696_vm0, %v2613_v32, 0.0 }
 0x6fe   : > { %2615 = vadd.xlane.f32.xlu0 %v2614_v18 }
 0x78b   : > { %v2616_v21 = vpop.xlane.xlu0 %2615 }
 0x78c   : > { %v2618_v22 = vmul.f32 0.03125, %v2616_v21 }
 0x78e   : > { %v2619_v23 = vsub.f32 %v2613_v32, %v2618_v22 }
 0x790   : > { %v2620_v24 = vmul.f32 %v2619_v23, %v2619_v23 }
 0x792   : > { %v2621_v25 = vsel %vm696_vm0, %v2620_v24, 0.0 }
 0x793   : > { %2622 = vadd.xlane.f32.xlu1 %v2621_v25 }
 0x820   : > { %v2623_v26 = vpop.xlane.xlu1 %2622 }
 0x821   : > { %v2624_v27 = vmul.f32 0.03125, %v2623_v26 }
 0x823   : > { %v2625_v28 = vadd.f32 1e-05, %v2624_v27 }
 0x825   : > { %3268 = vrsqrt.f32 %v2625_v28 }
 0x82f   : > { %v3269_v20 = vpop.eup %3268 }
 0x830   : > { %v2627_v33 = vmul.f32 %v3269_v20, %v2619_v23 }
 0x832   : > { %v2635_v35 = vmul.f32 %v2911_v31, %v2627_v33 }
 0x834   : > { %v2643_v36 = vadd.f32 %v2912_v34, %v2635_v35 }
 0x836   : > { %2644 = vst.msk [vmem:[%s674_s4] sm:$0xff] %vm696_vm0, %v2643_v36 }
 0x837   : > { %3515 = shalt.err (!%p3512_p13)
}
 0x838   : > { %s3516_s20 = scalar_lea.hbm %s4335_s13, 128  ;;  %s3520_s27 = scalar_lea.hbm %s4495_s11, 256 }
 0x839   : > { %p3517_p9 = scmp.ne.s32.totalorder %s4335_s13, %s3516_s20  ;;  %p3521_p4 = scmp.lt.u32.totalorder %s4335_s13, %s4495_s11 }
 0x83a   : > { %p3522_p11 = scmp.lt.u32.totalorder %s3520_s27, %s3516_s20  ;;  %p3524_p12 = scmp.lt.u32.totalorder %s3516_s20, %s4335_s13 }
 0x83b   : > { %p3518_p7 = pnand %p3517_p9, %p4496_p0 }
 0x83c   : > { %p3523_p1 = por %p3522_p11, %p3521_p4 }
 0x83d   : > { %p3519_p6 = pneg %p3518_p7 }
 0x83e   : > { %p3525_p3 = por %p3524_p12, %p3523_p1 }
 0x840   : > { %p3526_p2 = pnand %p3525_p3, %p3519_p6 }
 0x842   : > { %3529 = shalt.err (!%p3526_p2)
}
 0x843   : > { %3145 = dma.vmem_to_hbm [thread:$0]  (%p4496_p0), %s4337_s5, 128, %s4335_s13, %s2646_s24  }
 0x844 PF: > { %s4497_s19 = sld [smem:[#allocation26_spill]]  ;;  %s4498_s28 = sld [smem:[#allocation32_spill]] }
 0x845   : > { %p4500_p5 = scmp.ge.s32.totalorder %s3604_s18, 2 }
 0x84a   : > { %s2672_s9 = sand.u32 1, %s4497_s19   ;;  %p4499_p10 = scmp.ne.s32.totalorder %s4498_s28, 0 }
 0x84b   : > { %s2673_s10 = scalar_lea.sflag [#allocation6], %s2672_s9 }
 0x84c   : > { %p3174_p8 = pnand %p4500_p5, %p4499_p10 }
 0x84e   : > { %3579 = dma.done.wait (!%p3174_p8), %s2673_s10, 128  }
 0x84f   : > { %3581 = vsyncadd (!%p3174_p8), %s2673_s10, 4294967168  ;;  %s38_s18 = sadd.s32 1, %s3604_s18   ;;  %s4501_s29 = sld [smem:[#allocation27_spill]] }
 0x850   : > { %p35_p13 = scmp.ge.s32.totalorder %s38_s18, 4   ;;  %s4502_s30 = sld [smem:[#allocation28_spill]] }
 0x851   : > { %s4503_s15 = sld [smem:[#allocation35_spill]]  ;;  %s4504_s22 = sld [smem:[#allocation33_spill]] }
 0x852   : > { %s4505_s16 = smov %s3600_s17  ;;  %37 = sbr.rel (!%p35_p13) target bundleno = 23 (0x17), region = 178 }
 0x857   : > { %s4506_s17 = smov %s4504_s22 }
 0x859   :  { %2678 = vsyncpa [#allocation5], 1 }
 0x85a   :  { %2680 = vsyncpa [#allocation5 + $0x1], 1 }
 0x85b   :  { %2681 = vsyncpa [#allocation8], 1 }
 0x85c   :  { %2683 = vsyncpa [#allocation8 + $0x1], 1 }
 0x85d   :  { %2684 = vsyncpa [#allocation11], 1 }
 0x85e   :  { %2686 = vsyncpa [#allocation11 + $0x1], 1 }
 0x85f   :  { %2687 = vsyncpa [#allocation14], 1 }
 0x860   :  { %2688 = vsyncpa [#allocation17], 1 }
 0x861   :  { %2689 = vsyncpa [#allocation6], 1 }
 0x862   :  { %2691 = vsyncpa [#allocation6 + $0x1], 1 }

</bundles_post_ra>
